<compile_context>
chip_gen: v7x
topology: tpu7x:2x2x1
jax: 0.10.0
libtpu: 0.0.40
codegen_flags: <defaults>
</compile_context>

<pallas_src>
import jax
import jax.numpy as jnp
from jax.experimental import pallas as pl
from jax.experimental.pallas import tpu as pltpu

# ------------------------- config (small synthetic sizes) -------------------------
B, C_IN, H, W = 2, 3, 16, 16
PATCH = 4
HIDDEN = 32
FFN = 64
NUM_QUERIES = 8
NUM_CLASSES = 5                       # 4 foreground classes + 1 "no-object"
N_TOKENS = (H // PATCH) * (W // PATCH)
LANE = 128                            # lane-dense width for all padded activations
PATCH_DIM = C_IN * PATCH * PATCH      # 48
N_ENC = B * N_TOKENS                  # encoder rows (batch folded into sublanes)
N_DEC = B * NUM_QUERIES               # decoder rows

# ---- bf16 weight blob: 14 stacked [128,128] stripes (whole-tile row slices) ----
(W_PATCH, W_ENC_Q, W_ENC_K, W_ENC_V, W_ENC_O, W_ENC_F1, W_ENC_F2,
 W_DEC_Q, W_DEC_K, W_DEC_V, W_DEC_O, W_DEC_F1, W_DEC_F2, W_HEAD) = range(14)
N_W_STRIPES = 14

# ---- f32 blob row layout ----
R_QUERY = 0                            # [N_DEC , :HIDDEN]  pre-tiled query embed
R_ENC_MASK = R_QUERY + N_DEC           # [N_ENC , :N_ENC ]  encoder attn bias
R_DEC_MASK = R_ENC_MASK + N_ENC        # [N_DEC , :N_ENC ]  decoder attn bias
R_VECS = R_DEC_MASK + N_DEC            # 26 bias / LN rows follow

(V_PATCH_B,
 V_ENC_LN1_G, V_ENC_LN1_B, V_ENC_BQ, V_ENC_BK, V_ENC_BV, V_ENC_BO,
 V_ENC_LN2_G, V_ENC_LN2_B, V_ENC_B1, V_ENC_B2,
 V_DEC_LNM_G, V_DEC_LNM_B, V_DEC_LNQ_G, V_DEC_LNQ_B,
 V_DEC_BQ, V_DEC_BK, V_DEC_BV, V_DEC_BO,
 V_DEC_LN2_G, V_DEC_LN2_B, V_DEC_B1, V_DEC_B2,
 V_DEC_LN3_G, V_DEC_LN3_B, V_HEAD_B) = range(26)
N_VEC = 26
B_ROWS = R_VECS + ((N_VEC + 7) // 8) * 8     # pad vector rows to a multiple of 8


# ------------------------------- fused Pallas kernel ------------------------------
def _linea_fused_kernel(x_ref, w_ref, b_ref, out_ref):
    f32, bf16 = jnp.float32, jnp.bfloat16

    def wmat(i):                                   # [128,128] bf16 weight stripe
        return w_ref[i * LANE:(i + 1) * LANE, :]

    def vec(i):                                    # [1,128] f32 bias / LN row
        r = R_VECS + i
        return b_ref[r:r + 1, :]

    def mm(x, w_idx, b_idx):
        # bf16 MXU operands, f32 accumulation, fused bias add (bias stays f32).
        y = jnp.dot(x.astype(bf16), wmat(w_idx), preferred_element_type=f32)
        return y + vec(b_idx)

    def ln(x, g_idx, b_idx):
        # x is [rows,128] with lanes >= HIDDEN exactly zero; E[x^2]-mu^2 keeps the
        # statistics correct over the HIDDEN real features, gamma/beta pad = 0
        # keeps the pad lanes zero after normalization.
        mu = jnp.sum(x, axis=-1, keepdims=True) * (1.0 / HIDDEN)
        ex2 = jnp.sum(x * x, axis=-1, keepdims=True) * (1.0 / HIDDEN)
        inv = jax.lax.rsqrt(ex2 - mu * mu + 1e-5)
        return (x - mu) * inv * vec(g_idx) + vec(b_idx)

    def attn(q, k, v, bias):
        # Batch folded into rows; `bias` is the precomputed block-diagonal 0/-1e30
        # additive mask. The 1/sqrt(d) scale is folded into Wq/bq at pack time.
        s = jax.lax.dot_general(
            q.astype(bf16), k.astype(bf16),
            dimension_numbers=(((1,), (1,)), ((), ())),   # q @ k^T, no transpose
            preferred_element_type=f32) + bias
        m = jnp.max(s, axis=-1, keepdims=True)
        p = jnp.exp(s - m)
        l = jnp.sum(p, axis=-1, keepdims=True)
        o = jnp.dot(p.astype(bf16), v.astype(bf16), preferred_element_type=f32)
        return o * pl.reciprocal(l, approx=True)

    enc_bias = b_ref[R_ENC_MASK:R_ENC_MASK + N_ENC, :N_ENC]    # [N_ENC, N_ENC]
    dec_bias = b_ref[R_DEC_MASK:R_DEC_MASK + N_DEC, :N_ENC]    # [N_DEC, N_ENC]

    # ---- backbone: patch-embed "conv" (kernel=stride=PATCH) as one matmul ----
    feat = mm(x_ref[...], W_PATCH, V_PATCH_B)                  # [N_ENC, 128]

    # ---- encoder: pre-LN self-attention + FFN ----
    hn = ln(feat, V_ENC_LN1_G, V_ENC_LN1_B)
    q = mm(hn, W_ENC_Q, V_ENC_BQ)
    k = mm(hn, W_ENC_K, V_ENC_BK)
    v = mm(hn, W_ENC_V, V_ENC_BV)
    a = attn(q, k, v, enc_bias)
    feat = feat + mm(a, W_ENC_O, V_ENC_BO)
    hn = ln(feat, V_ENC_LN2_G, V_ENC_LN2_B)
    hn = jnp.maximum(mm(hn, W_ENC_F1, V_ENC_B1), 0.0)
    feat = feat + mm(hn, W_ENC_F2, V_ENC_B2)

    # ---- decoder: learned queries cross-attend to encoder memory ----
    mem = ln(feat, V_DEC_LNM_G, V_DEC_LNM_B)
    qry = b_ref[R_QUERY:R_QUERY + N_DEC, :]                    # pre-tiled [N_DEC,128]
    qh = ln(qry, V_DEC_LNQ_G, V_DEC_LNQ_B)
    q = mm(qh, W_DEC_Q, V_DEC_BQ)
    k = mm(mem, W_DEC_K, V_DEC_BK)
    v = mm(mem, W_DEC_V, V_DEC_BV)
    a = attn(q, k, v, dec_bias)
    dec = qry + mm(a, W_DEC_O, V_DEC_BO)
    hn = ln(dec, V_DEC_LN2_G, V_DEC_LN2_B)
    hn = jnp.maximum(mm(hn, W_DEC_F1, V_DEC_B1), 0.0)
    dec = dec + mm(hn, W_DEC_F2, V_DEC_B2)
    dec = ln(dec, V_DEC_LN3_G, V_DEC_LN3_B)

    # ---- fused heads: [cls | box | zero-pad] -> single lane-dense 128-wide store ----
    y = mm(dec, W_HEAD, V_HEAD_B)                              # [N_DEC, 128]
    col = jax.lax.broadcasted_iota(jnp.int32, y.shape, 1)
    box_cols = (col >= NUM_CLASSES) & (col < NUM_CLASSES + 4)
    y = jnp.where(box_cols, jax.nn.sigmoid(y), y)              # sigmoid only on box cols
    out_ref[...] = y.astype(out_ref.dtype)


# ------------------------------ parameter init / pack -----------------------------
def init_params(key):
    keys = list(jax.random.split(key, 64))
    it = iter(keys)

    def rnd(shape, scale=0.02):
        return scale * jax.random.normal(next(it), shape, jnp.float32)

    z = lambda s: jnp.zeros(s, jnp.float32)
    o = lambda s: jnp.ones(s, jnp.float32)

    p = {}
    p["patch_w"] = rnd((PATCH_DIM, HIDDEN))
    p["patch_b"] = z((HIDDEN,))
    p["enc_ln1_g"], p["enc_ln1_b"] = o((HIDDEN,)), z((HIDDEN,))
    for n in ("q", "k", "v", "o"):
        p[f"enc_w{n}"] = rnd((HIDDEN, HIDDEN))
        p[f"enc_b{n}"] = z((HIDDEN,))
    p["enc_ln2_g"], p["enc_ln2_b"] = o((HIDDEN,)), z((HIDDEN,))
    p["enc_w1"], p["enc_b1"] = rnd((HIDDEN, FFN)), z((FFN,))
    p["enc_w2"], p["enc_b2"] = rnd((FFN, HIDDEN)), z((HIDDEN,))
    p["query_embed"] = rnd((NUM_QUERIES, HIDDEN), scale=0.1)
    p["dec_lnm_g"], p["dec_lnm_b"] = o((HIDDEN,)), z((HIDDEN,))
    p["dec_lnq_g"], p["dec_lnq_b"] = o((HIDDEN,)), z((HIDDEN,))
    for n in ("q", "k", "v", "o"):
        p[f"dec_w{n}"] = rnd((HIDDEN, HIDDEN))
        p[f"dec_b{n}"] = z((HIDDEN,))
    p["dec_ln2_g"], p["dec_ln2_b"] = o((HIDDEN,)), z((HIDDEN,))
    p["dec_w1"], p["dec_b1"] = rnd((HIDDEN, FFN)), z((FFN,))
    p["dec_w2"], p["dec_b2"] = rnd((FFN, HIDDEN)), z((HIDDEN,))
    p["dec_ln3_g"], p["dec_ln3_b"] = o((HIDDEN,)), z((HIDDEN,))
    p["cls_w"], p["cls_b"] = rnd((HIDDEN, NUM_CLASSES)), z((NUM_CLASSES,))
    p["box_w"], p["box_b"] = rnd((HIDDEN, 4)), z((4,))
    return p


def _block_diag_bias(rq_per, rk_per):
    """Additive 0 / -1e30 block-diagonal mask (batch folded into rows)."""
    rq, rk = B * rq_per, B * rk_per
    rb = jnp.arange(rq)[:, None] // rq_per
    cb = jnp.arange(rk)[None, :] // rk_per
    return jnp.where(rb == cb, 0.0, -1e30).astype(jnp.float32)


def pack_params(p):
    """Pack all parameters into two tile-aligned blobs:
       w_blob: [14*128, 128] bf16  (one zero-padded [128,128] stripe per weight;
               1/sqrt(d) attention scale folded into the Q stripes)
       b_blob: [96, 128]     f32   (tiled query embed, attention bias masks,
               all bias / LayerNorm rows; 1/sqrt(d) folded into bq rows)
    """
    scale = 1.0 / float(HIDDEN) ** 0.5

    w_blob = jnp.zeros((N_W_STRIPES * LANE, LANE), jnp.float32)

    def put_w(blob, idx, w):
        r, c = w.shape
        return blob.at[idx * LANE: idx * LANE + r, :c].set(w)

    head_w = jnp.zeros((HIDDEN, LANE), jnp.float32)
    head_w = head_w.at[:, :NUM_CLASSES].set(p["cls_w"])
    head_w = head_w.at[:, NUM_CLASSES:NUM_CLASSES + 4].set(p["box_w"])

    w_blob = put_w(w_blob, W_PATCH, p["patch_w"])
    w_blob = put_w(w_blob, W_ENC_Q, p["enc_wq"] * scale)
    w_blob = put_w(w_blob, W_ENC_K, p["enc_wk"])
    w_blob = put_w(w_blob, W_ENC_V, p["enc_wv"])
    w_blob = put_w(w_blob, W_ENC_O, p["enc_wo"])
    w_blob = put_w(w_blob, W_ENC_F1, p["enc_w1"])
    w_blob = put_w(w_blob, W_ENC_F2, p["enc_w2"])
    w_blob = put_w(w_blob, W_DEC_Q, p["dec_wq"] * scale)
    w_blob = put_w(w_blob, W_DEC_K, p["dec_wk"])
    w_blob = put_w(w_blob, W_DEC_V, p["dec_wv"])
    w_blob = put_w(w_blob, W_DEC_O, p["dec_wo"])
    w_blob = put_w(w_blob, W_DEC_F1, p["dec_w1"])
    w_blob = put_w(w_blob, W_DEC_F2, p["dec_w2"])
    w_blob = put_w(w_blob, W_HEAD, head_w)

    b_blob = jnp.zeros((B_ROWS, LANE), jnp.float32)
    b_blob = b_blob.at[R_QUERY:R_QUERY + N_DEC, :HIDDEN].set(
        jnp.tile(p["query_embed"], (B, 1)))
    b_blob = b_blob.at[R_ENC_MASK:R_ENC_MASK + N_ENC, :N_ENC].set(
        _block_diag_bias(N_TOKENS, N_TOKENS))
    b_blob = b_blob.at[R_DEC_MASK:R_DEC_MASK + N_DEC, :N_ENC].set(
        _block_diag_bias(NUM_QUERIES, N_TOKENS))

    head_b = jnp.zeros((LANE,), jnp.float32)
    head_b = head_b.at[:NUM_CLASSES].set(p["cls_b"])
    head_b = head_b.at[NUM_CLASSES:NUM_CLASSES + 4].set(p["box_b"])

    vec_rows = [
        (V_PATCH_B, p["patch_b"]),
        (V_ENC_LN1_G, p["enc_ln1_g"]), (V_ENC_LN1_B, p["enc_ln1_b"]),
        (V_ENC_BQ, p["enc_bq"] * scale), (V_ENC_BK, p["enc_bk"]),
        (V_ENC_BV, p["enc_bv"]), (V_ENC_BO, p["enc_bo"]),
        (V_ENC_LN2_G, p["enc_ln2_g"]), (V_ENC_LN2_B, p["enc_ln2_b"]),
        (V_ENC_B1, p["enc_b1"]), (V_ENC_B2, p["enc_b2"]),
        (V_DEC_LNM_G, p["dec_lnm_g"]), (V_DEC_LNM_B, p["dec_lnm_b"]),
        (V_DEC_LNQ_G, p["dec_lnq_g"]), (V_DEC_LNQ_B, p["dec_lnq_b"]),
        (V_DEC_BQ, p["dec_bq"] * scale), (V_DEC_BK, p["dec_bk"]),
        (V_DEC_BV, p["dec_bv"]), (V_DEC_BO, p["dec_bo"]),
        (V_DEC_LN2_G, p["dec_ln2_g"]), (V_DEC_LN2_B, p["dec_ln2_b"]),
        (V_DEC_B1, p["dec_b1"]), (V_DEC_B2, p["dec_b2"]),
        (V_DEC_LN3_G, p["dec_ln3_g"]), (V_DEC_LN3_B, p["dec_ln3_b"]),
        (V_HEAD_B, head_b),
    ]
    for idx, v in vec_rows:
        b_blob = b_blob.at[R_VECS + idx, :v.shape[0]].set(v)

    return {"w_blob": w_blob.astype(jnp.bfloat16), "b_blob": b_blob}


# --------------------------------- forward wrapper ---------------------------------
def linea_forward(packed, samples):
    """samples: NCHW [B, 3, H, W] -> {'pred_logits': [B, Nq, C], 'pred_boxes': [B, Nq, 4]}"""
    b, c, h, w = samples.shape
    # im2col patchify (pure layout glue) so the patch-embed conv becomes one matmul;
    # pad lanes to 128 and cast to bf16 on the host (halves the activation DMA).
    x = samples.reshape(b, c, h // PATCH, PATCH, w // PATCH, PATCH)
    x = x.transpose(0, 2, 4, 1, 3, 5).reshape(b * N_TOKENS, PATCH_DIM)
    x = jnp.pad(x, ((0, 0), (0, LANE - PATCH_DIM))).astype(jnp.bfloat16)

    w_blob, b_blob = packed["w_blob"], packed["b_blob"]

    out = pl.pallas_call(
        _linea_fused_kernel,
        out_shape=jax.ShapeDtypeStruct((b * NUM_QUERIES, LANE), jnp.float32),
        in_specs=[
            pl.BlockSpec(x.shape, lambda: (0, 0)),
            pl.BlockSpec(w_blob.shape, lambda: (0, 0)),
            pl.BlockSpec(b_blob.shape, lambda: (0, 0)),
        ],
        out_specs=pl.BlockSpec((b * NUM_QUERIES, LANE), lambda: (0, 0)),
    )(x, w_blob, b_blob)

    out = out.reshape(b, NUM_QUERIES, LANE)
    return {
        "pred_logits": out[:, :, :NUM_CLASSES],
        "pred_boxes": out[:, :, NUM_CLASSES:NUM_CLASSES + 4],
    }


# ----------------------------------- main ------------------------------------------
if __name__ == "__main__":
    key = jax.random.PRNGKey(0)
    k_param, k_data = jax.random.split(key)
    params = pack_params(init_params(k_param))
    samples = jax.random.normal(k_data, (B, C_IN, H, W), jnp.float32)   # NCHW, like PyTorch

    fwd = jax.jit(linea_forward)
    out = fwd(params, samples)
    jax.block_until_ready(out)

    assert out["pred_logits"].shape == (B, NUM_QUERIES, NUM_CLASSES)
    assert out["pred_boxes"].shape == (B, NUM_QUERIES, 4)
    assert bool(jnp.all(jnp.isfinite(out["pred_logits"])))
    assert bool(jnp.all((out["pred_boxes"] >= 0.0) & (out["pred_boxes"] <= 1.0)))
    print("KERNEL_OK")
</pallas_src>

<mosaic_0001>
module attributes {stable_mosaic.version = 11 : i64} {
  func.func @_linea_fused_kernel(%arg0: memref<32x128xbf16, #tpu.memory_space<vmem>>, %arg1: memref<1792x128xbf16, #tpu.memory_space<vmem>>, %arg2: memref<96x128xf32, #tpu.memory_space<vmem>>, %arg3: memref<16x128xf32, #tpu.memory_space<vmem>>) attributes {dimension_semantics = [], scalar_prefetch = 0 : i64, scratch_operands = 0 : i64, tpu.core_type = #tpu.core_type<tc>} {
    %c16 = arith.constant 16 : index
    %c0 = arith.constant 0 : index
    %0 = vector.load %arg2[%c16, %c0] : memref<96x128xf32, #tpu.memory_space<vmem>>, vector<32x32xf32>
    %c48 = arith.constant 48 : index
    %c0_0 = arith.constant 0 : index
    %1 = vector.load %arg2[%c48, %c0_0] : memref<96x128xf32, #tpu.memory_space<vmem>>, vector<16x32xf32>
    %c0_1 = arith.constant 0 : index
    %c0_2 = arith.constant 0 : index
    %2 = vector.load %arg0[%c0_1, %c0_2] : memref<32x128xbf16, #tpu.memory_space<vmem>>, vector<32x128xbf16>
    %c0_3 = arith.constant 0 : index
    %c0_4 = arith.constant 0 : index
    %3 = vector.load %arg1[%c0_3, %c0_4] : memref<1792x128xbf16, #tpu.memory_space<vmem>>, vector<128x128xbf16>
    %cst = arith.constant dense<0.000000e+00> : vector<32x128xf32>
    %4 = tpu.matmul %2, %3, %cst {dimension_numbers = #tpu.dot_dimension_numbers<[1], [0], [0], [1], [0, 0, 1, 1], [], []>} : vector<32x128xbf16>, vector<128x128xbf16>, vector<32x128xf32> -> vector<32x128xf32>
    %c64 = arith.constant 64 : index
    %c0_5 = arith.constant 0 : index
    %5 = vector.load %arg2[%c64, %c0_5] : memref<96x128xf32, #tpu.memory_space<vmem>>, vector<1x128xf32>
    %6 = vector.broadcast %5 : vector<1x128xf32> to vector<32x128xf32>
    %7 = arith.addf %4, %6 : vector<32x128xf32>
    %cst_6 = arith.constant dense<0.000000e+00> : vector<32xf32>
    %8 = vector.multi_reduction <add>, %7, %cst_6 [1] : vector<32x128xf32> to vector<32xf32>
    %9 = vector.shape_cast %8 : vector<32xf32> to vector<32x1xf32>
    %cst_7 = arith.constant 3.125000e-02 : f32
    %10 = vector.broadcast %cst_7 : f32 to vector<32x1xf32>
    %11 = arith.mulf %9, %10 : vector<32x1xf32>
    %12 = arith.mulf %7, %7 : vector<32x128xf32>
    %cst_8 = arith.constant dense<0.000000e+00> : vector<32xf32>
    %13 = vector.multi_reduction <add>, %12, %cst_8 [1] : vector<32x128xf32> to vector<32xf32>
    %14 = vector.shape_cast %13 : vector<32xf32> to vector<32x1xf32>
    %cst_9 = arith.constant 3.125000e-02 : f32
    %15 = vector.broadcast %cst_9 : f32 to vector<32x1xf32>
    %16 = arith.mulf %14, %15 : vector<32x1xf32>
    %17 = arith.mulf %11, %11 : vector<32x1xf32>
    %18 = arith.subf %16, %17 : vector<32x1xf32>
    %cst_10 = arith.constant 9.99999974E-6 : f32
    %19 = vector.broadcast %cst_10 : f32 to vector<32x1xf32>
    %20 = arith.addf %18, %19 : vector<32x1xf32>
    %21 = math.rsqrt %20 : vector<32x1xf32>
    %22 = vector.broadcast %11 : vector<32x1xf32> to vector<32x128xf32>
    %23 = arith.subf %7, %22 : vector<32x128xf32>
    %24 = vector.broadcast %21 : vector<32x1xf32> to vector<32x128xf32>
    %25 = arith.mulf %23, %24 : vector<32x128xf32>
    %c65 = arith.constant 65 : index
    %c0_11 = arith.constant 0 : index
    %26 = vector.load %arg2[%c65, %c0_11] : memref<96x128xf32, #tpu.memory_space<vmem>>, vector<1x128xf32>
    %27 = vector.broadcast %26 : vector<1x128xf32> to vector<32x128xf32>
    %28 = arith.mulf %25, %27 : vector<32x128xf32>
    %c66 = arith.constant 66 : index
    %c0_12 = arith.constant 0 : index
    %29 = vector.load %arg2[%c66, %c0_12] : memref<96x128xf32, #tpu.memory_space<vmem>>, vector<1x128xf32>
    %30 = vector.broadcast %29 : vector<1x128xf32> to vector<32x128xf32>
    %31 = arith.addf %28, %30 : vector<32x128xf32>
    %32 = arith.truncf %31 : vector<32x128xf32> to vector<32x128xbf16>
    %c128 = arith.constant 128 : index
    %c0_13 = arith.constant 0 : index
    %33 = vector.load %arg1[%c128, %c0_13] : memref<1792x128xbf16, #tpu.memory_space<vmem>>, vector<128x128xbf16>
    %cst_14 = arith.constant dense<0.000000e+00> : vector<32x128xf32>
    %34 = tpu.matmul %32, %33, %cst_14 {dimension_numbers = #tpu.dot_dimension_numbers<[1], [0], [0], [1], [0, 0, 1, 1], [], []>} : vector<32x128xbf16>, vector<128x128xbf16>, vector<32x128xf32> -> vector<32x128xf32>
    %c67 = arith.constant 67 : index
    %c0_15 = arith.constant 0 : index
    %35 = vector.load %arg2[%c67, %c0_15] : memref<96x128xf32, #tpu.memory_space<vmem>>, vector<1x128xf32>
    %36 = vector.broadcast %35 : vector<1x128xf32> to vector<32x128xf32>
    %37 = arith.addf %34, %36 : vector<32x128xf32>
    %38 = arith.truncf %31 : vector<32x128xf32> to vector<32x128xbf16>
    %c256 = arith.constant 256 : index
    %c0_16 = arith.constant 0 : index
    %39 = vector.load %arg1[%c256, %c0_16] : memref<1792x128xbf16, #tpu.memory_space<vmem>>, vector<128x128xbf16>
    %cst_17 = arith.constant dense<0.000000e+00> : vector<32x128xf32>
    %40 = tpu.matmul %38, %39, %cst_17 {dimension_numbers = #tpu.dot_dimension_numbers<[1], [0], [0], [1], [0, 0, 1, 1], [], []>} : vector<32x128xbf16>, vector<128x128xbf16>, vector<32x128xf32> -> vector<32x128xf32>
    %c68 = arith.constant 68 : index
    %c0_18 = arith.constant 0 : index
    %41 = vector.load %arg2[%c68, %c0_18] : memref<96x128xf32, #tpu.memory_space<vmem>>, vector<1x128xf32>
    %42 = vector.broadcast %41 : vector<1x128xf32> to vector<32x128xf32>
    %43 = arith.addf %40, %42 : vector<32x128xf32>
    %44 = arith.truncf %31 : vector<32x128xf32> to vector<32x128xbf16>
    %c384 = arith.constant 384 : index
    %c0_19 = arith.constant 0 : index
    %45 = vector.load %arg1[%c384, %c0_19] : memref<1792x128xbf16, #tpu.memory_space<vmem>>, vector<128x128xbf16>
    %cst_20 = arith.constant dense<0.000000e+00> : vector<32x128xf32>
    %46 = tpu.matmul %44, %45, %cst_20 {dimension_numbers = #tpu.dot_dimension_numbers<[1], [0], [0], [1], [0, 0, 1, 1], [], []>} : vector<32x128xbf16>, vector<128x128xbf16>, vector<32x128xf32> -> vector<32x128xf32>
    %c69 = arith.constant 69 : index
    %c0_21 = arith.constant 0 : index
    %47 = vector.load %arg2[%c69, %c0_21] : memref<96x128xf32, #tpu.memory_space<vmem>>, vector<1x128xf32>
    %48 = vector.broadcast %47 : vector<1x128xf32> to vector<32x128xf32>
    %49 = arith.addf %46, %48 : vector<32x128xf32>
    %50 = arith.truncf %37 : vector<32x128xf32> to vector<32x128xbf16>
    %51 = arith.truncf %43 : vector<32x128xf32> to vector<32x128xbf16>
    %cst_22 = arith.constant dense<0.000000e+00> : vector<32x32xf32>
    %52 = tpu.matmul %50, %51, %cst_22 {dimension_numbers = #tpu.dot_dimension_numbers<[1], [1], [0], [0], [0, 0, 1, 0], [], []>} : vector<32x128xbf16>, vector<32x128xbf16>, vector<32x32xf32> -> vector<32x32xf32>
    %53 = arith.addf %52, %0 : vector<32x32xf32>
    %cst_23 = arith.constant dense<0xFF800000> : vector<32xf32>
    %54 = vector.multi_reduction <maximumf>, %53, %cst_23 [1] : vector<32x32xf32> to vector<32xf32>
    %55 = vector.shape_cast %54 : vector<32xf32> to vector<32x1xf32>
    %56 = vector.broadcast %55 : vector<32x1xf32> to vector<32x32xf32>
    %57 = arith.subf %53, %56 : vector<32x32xf32>
    %58 = math.exp %57 : vector<32x32xf32>
    %cst_24 = arith.constant dense<0.000000e+00> : vector<32xf32>
    %59 = vector.multi_reduction <add>, %58, %cst_24 [1] : vector<32x32xf32> to vector<32xf32>
    %60 = vector.shape_cast %59 : vector<32xf32> to vector<32x1xf32>
    %61 = arith.truncf %58 : vector<32x32xf32> to vector<32x32xbf16>
    %62 = arith.truncf %49 : vector<32x128xf32> to vector<32x128xbf16>
    %cst_25 = arith.constant dense<0.000000e+00> : vector<32x128xf32>
    %63 = tpu.matmul %61, %62, %cst_25 {dimension_numbers = #tpu.dot_dimension_numbers<[1], [0], [0], [1], [0, 0, 1, 1], [], []>} : vector<32x32xbf16>, vector<32x128xbf16>, vector<32x128xf32> -> vector<32x128xf32>
    %64 = tpu.reciprocal %60 {approx = true} : vector<32x1xf32> -> vector<32x1xf32>
    %65 = vector.broadcast %64 : vector<32x1xf32> to vector<32x128xf32>
    %66 = arith.mulf %63, %65 : vector<32x128xf32>
    %67 = arith.truncf %66 : vector<32x128xf32> to vector<32x128xbf16>
    %c512 = arith.constant 512 : index
    %c0_26 = arith.constant 0 : index
    %68 = vector.load %arg1[%c512, %c0_26] : memref<1792x128xbf16, #tpu.memory_space<vmem>>, vector<128x128xbf16>
    %cst_27 = arith.constant dense<0.000000e+00> : vector<32x128xf32>
    %69 = tpu.matmul %67, %68, %cst_27 {dimension_numbers = #tpu.dot_dimension_numbers<[1], [0], [0], [1], [0, 0, 1, 1], [], []>} : vector<32x128xbf16>, vector<128x128xbf16>, vector<32x128xf32> -> vector<32x128xf32>
    %c70 = arith.constant 70 : index
    %c0_28 = arith.constant 0 : index
    %70 = vector.load %arg2[%c70, %c0_28] : memref<96x128xf32, #tpu.memory_space<vmem>>, vector<1x128xf32>
    %71 = vector.broadcast %70 : vector<1x128xf32> to vector<32x128xf32>
    %72 = arith.addf %69, %71 : vector<32x128xf32>
    %73 = arith.addf %7, %72 : vector<32x128xf32>
    %cst_29 = arith.constant dense<0.000000e+00> : vector<32xf32>
    %74 = vector.multi_reduction <add>, %73, %cst_29 [1] : vector<32x128xf32> to vector<32xf32>
    %75 = vector.shape_cast %74 : vector<32xf32> to vector<32x1xf32>
    %cst_30 = arith.constant 3.125000e-02 : f32
    %76 = vector.broadcast %cst_30 : f32 to vector<32x1xf32>
    %77 = arith.mulf %75, %76 : vector<32x1xf32>
    %78 = arith.mulf %73, %73 : vector<32x128xf32>
    %cst_31 = arith.constant dense<0.000000e+00> : vector<32xf32>
    %79 = vector.multi_reduction <add>, %78, %cst_31 [1] : vector<32x128xf32> to vector<32xf32>
    %80 = vector.shape_cast %79 : vector<32xf32> to vector<32x1xf32>
    %cst_32 = arith.constant 3.125000e-02 : f32
    %81 = vector.broadcast %cst_32 : f32 to vector<32x1xf32>
    %82 = arith.mulf %80, %81 : vector<32x1xf32>
    %83 = arith.mulf %77, %77 : vector<32x1xf32>
    %84 = arith.subf %82, %83 : vector<32x1xf32>
    %cst_33 = arith.constant 9.99999974E-6 : f32
    %85 = vector.broadcast %cst_33 : f32 to vector<32x1xf32>
    %86 = arith.addf %84, %85 : vector<32x1xf32>
    %87 = math.rsqrt %86 : vector<32x1xf32>
    %88 = vector.broadcast %77 : vector<32x1xf32> to vector<32x128xf32>
    %89 = arith.subf %73, %88 : vector<32x128xf32>
    %90 = vector.broadcast %87 : vector<32x1xf32> to vector<32x128xf32>
    %91 = arith.mulf %89, %90 : vector<32x128xf32>
    %c71 = arith.constant 71 : index
    %c0_34 = arith.constant 0 : index
    %92 = vector.load %arg2[%c71, %c0_34] : memref<96x128xf32, #tpu.memory_space<vmem>>, vector<1x128xf32>
    %93 = vector.broadcast %92 : vector<1x128xf32> to vector<32x128xf32>
    %94 = arith.mulf %91, %93 : vector<32x128xf32>
    %c72 = arith.constant 72 : index
    %c0_35 = arith.constant 0 : index
    %95 = vector.load %arg2[%c72, %c0_35] : memref<96x128xf32, #tpu.memory_space<vmem>>, vector<1x128xf32>
    %96 = vector.broadcast %95 : vector<1x128xf32> to vector<32x128xf32>
    %97 = arith.addf %94, %96 : vector<32x128xf32>
    %98 = arith.truncf %97 : vector<32x128xf32> to vector<32x128xbf16>
    %c640 = arith.constant 640 : index
    %c0_36 = arith.constant 0 : index
    %99 = vector.load %arg1[%c640, %c0_36] : memref<1792x128xbf16, #tpu.memory_space<vmem>>, vector<128x128xbf16>
    %cst_37 = arith.constant dense<0.000000e+00> : vector<32x128xf32>
    %100 = tpu.matmul %98, %99, %cst_37 {dimension_numbers = #tpu.dot_dimension_numbers<[1], [0], [0], [1], [0, 0, 1, 1], [], []>} : vector<32x128xbf16>, vector<128x128xbf16>, vector<32x128xf32> -> vector<32x128xf32>
    %c73 = arith.constant 73 : index
    %c0_38 = arith.constant 0 : index
    %101 = vector.load %arg2[%c73, %c0_38] : memref<96x128xf32, #tpu.memory_space<vmem>>, vector<1x128xf32>
    %102 = vector.broadcast %101 : vector<1x128xf32> to vector<32x128xf32>
    %103 = arith.addf %100, %102 : vector<32x128xf32>
    %cst_39 = arith.constant 0.000000e+00 : f32
    %104 = vector.broadcast %cst_39 : f32 to vector<32x128xf32>
    %105 = arith.maximumf %103, %104 : vector<32x128xf32>
    %106 = arith.truncf %105 : vector<32x128xf32> to vector<32x128xbf16>
    %c768 = arith.constant 768 : index
    %c0_40 = arith.constant 0 : index
    %107 = vector.load %arg1[%c768, %c0_40] : memref<1792x128xbf16, #tpu.memory_space<vmem>>, vector<128x128xbf16>
    %cst_41 = arith.constant dense<0.000000e+00> : vector<32x128xf32>
    %108 = tpu.matmul %106, %107, %cst_41 {dimension_numbers = #tpu.dot_dimension_numbers<[1], [0], [0], [1], [0, 0, 1, 1], [], []>} : vector<32x128xbf16>, vector<128x128xbf16>, vector<32x128xf32> -> vector<32x128xf32>
    %c74 = arith.constant 74 : index
    %c0_42 = arith.constant 0 : index
    %109 = vector.load %arg2[%c74, %c0_42] : memref<96x128xf32, #tpu.memory_space<vmem>>, vector<1x128xf32>
    %110 = vector.broadcast %109 : vector<1x128xf32> to vector<32x128xf32>
    %111 = arith.addf %108, %110 : vector<32x128xf32>
    %112 = arith.addf %73, %111 : vector<32x128xf32>
    %cst_43 = arith.constant dense<0.000000e+00> : vector<32xf32>
    %113 = vector.multi_reduction <add>, %112, %cst_43 [1] : vector<32x128xf32> to vector<32xf32>
    %114 = vector.shape_cast %113 : vector<32xf32> to vector<32x1xf32>
    %cst_44 = arith.constant 3.125000e-02 : f32
    %115 = vector.broadcast %cst_44 : f32 to vector<32x1xf32>
    %116 = arith.mulf %114, %115 : vector<32x1xf32>
    %117 = arith.mulf %112, %112 : vector<32x128xf32>
    %cst_45 = arith.constant dense<0.000000e+00> : vector<32xf32>
    %118 = vector.multi_reduction <add>, %117, %cst_45 [1] : vector<32x128xf32> to vector<32xf32>
    %119 = vector.shape_cast %118 : vector<32xf32> to vector<32x1xf32>
    %cst_46 = arith.constant 3.125000e-02 : f32
    %120 = vector.broadcast %cst_46 : f32 to vector<32x1xf32>
    %121 = arith.mulf %119, %120 : vector<32x1xf32>
    %122 = arith.mulf %116, %116 : vector<32x1xf32>
    %123 = arith.subf %121, %122 : vector<32x1xf32>
    %cst_47 = arith.constant 9.99999974E-6 : f32
    %124 = vector.broadcast %cst_47 : f32 to vector<32x1xf32>
    %125 = arith.addf %123, %124 : vector<32x1xf32>
    %126 = math.rsqrt %125 : vector<32x1xf32>
    %127 = vector.broadcast %116 : vector<32x1xf32> to vector<32x128xf32>
    %128 = arith.subf %112, %127 : vector<32x128xf32>
    %129 = vector.broadcast %126 : vector<32x1xf32> to vector<32x128xf32>
    %130 = arith.mulf %128, %129 : vector<32x128xf32>
    %c75 = arith.constant 75 : index
    %c0_48 = arith.constant 0 : index
    %131 = vector.load %arg2[%c75, %c0_48] : memref<96x128xf32, #tpu.memory_space<vmem>>, vector<1x128xf32>
    %132 = vector.broadcast %131 : vector<1x128xf32> to vector<32x128xf32>
    %133 = arith.mulf %130, %132 : vector<32x128xf32>
    %c76 = arith.constant 76 : index
    %c0_49 = arith.constant 0 : index
    %134 = vector.load %arg2[%c76, %c0_49] : memref<96x128xf32, #tpu.memory_space<vmem>>, vector<1x128xf32>
    %135 = vector.broadcast %134 : vector<1x128xf32> to vector<32x128xf32>
    %136 = arith.addf %133, %135 : vector<32x128xf32>
    %c0_50 = arith.constant 0 : index
    %c0_51 = arith.constant 0 : index
    %137 = vector.load %arg2[%c0_50, %c0_51] : memref<96x128xf32, #tpu.memory_space<vmem>>, vector<16x128xf32>
    %cst_52 = arith.constant dense<0.000000e+00> : vector<16xf32>
    %138 = vector.multi_reduction <add>, %137, %cst_52 [1] : vector<16x128xf32> to vector<16xf32>
    %139 = vector.shape_cast %138 : vector<16xf32> to vector<16x1xf32>
    %cst_53 = arith.constant 3.125000e-02 : f32
    %140 = vector.broadcast %cst_53 : f32 to vector<16x1xf32>
    %141 = arith.mulf %139, %140 : vector<16x1xf32>
    %142 = arith.mulf %137, %137 : vector<16x128xf32>
    %cst_54 = arith.constant dense<0.000000e+00> : vector<16xf32>
    %143 = vector.multi_reduction <add>, %142, %cst_54 [1] : vector<16x128xf32> to vector<16xf32>
    %144 = vector.shape_cast %143 : vector<16xf32> to vector<16x1xf32>
    %cst_55 = arith.constant 3.125000e-02 : f32
    %145 = vector.broadcast %cst_55 : f32 to vector<16x1xf32>
    %146 = arith.mulf %144, %145 : vector<16x1xf32>
    %147 = arith.mulf %141, %141 : vector<16x1xf32>
    %148 = arith.subf %146, %147 : vector<16x1xf32>
    %cst_56 = arith.constant 9.99999974E-6 : f32
    %149 = vector.broadcast %cst_56 : f32 to vector<16x1xf32>
    %150 = arith.addf %148, %149 : vector<16x1xf32>
    %151 = math.rsqrt %150 : vector<16x1xf32>
    %152 = vector.broadcast %141 : vector<16x1xf32> to vector<16x128xf32>
    %153 = arith.subf %137, %152 : vector<16x128xf32>
    %154 = vector.broadcast %151 : vector<16x1xf32> to vector<16x128xf32>
    %155 = arith.mulf %153, %154 : vector<16x128xf32>
    %c77 = arith.constant 77 : index
    %c0_57 = arith.constant 0 : index
    %156 = vector.load %arg2[%c77, %c0_57] : memref<96x128xf32, #tpu.memory_space<vmem>>, vector<1x128xf32>
    %157 = vector.broadcast %156 : vector<1x128xf32> to vector<16x128xf32>
    %158 = arith.mulf %155, %157 : vector<16x128xf32>
    %c78 = arith.constant 78 : index
    %c0_58 = arith.constant 0 : index
    %159 = vector.load %arg2[%c78, %c0_58] : memref<96x128xf32, #tpu.memory_space<vmem>>, vector<1x128xf32>
    %160 = vector.broadcast %159 : vector<1x128xf32> to vector<16x128xf32>
    %161 = arith.addf %158, %160 : vector<16x128xf32>
    %162 = arith.truncf %161 : vector<16x128xf32> to vector<16x128xbf16>
    %c896 = arith.constant 896 : index
    %c0_59 = arith.constant 0 : index
    %163 = vector.load %arg1[%c896, %c0_59] : memref<1792x128xbf16, #tpu.memory_space<vmem>>, vector<128x128xbf16>
    %cst_60 = arith.constant dense<0.000000e+00> : vector<16x128xf32>
    %164 = tpu.matmul %162, %163, %cst_60 {dimension_numbers = #tpu.dot_dimension_numbers<[1], [0], [0], [1], [0, 0, 1, 1], [], []>} : vector<16x128xbf16>, vector<128x128xbf16>, vector<16x128xf32> -> vector<16x128xf32>
    %c79 = arith.constant 79 : index
    %c0_61 = arith.constant 0 : index
    %165 = vector.load %arg2[%c79, %c0_61] : memref<96x128xf32, #tpu.memory_space<vmem>>, vector<1x128xf32>
    %166 = vector.broadcast %165 : vector<1x128xf32> to vector<16x128xf32>
    %167 = arith.addf %164, %166 : vector<16x128xf32>
    %168 = arith.truncf %136 : vector<32x128xf32> to vector<32x128xbf16>
    %c1024 = arith.constant 1024 : index
    %c0_62 = arith.constant 0 : index
    %169 = vector.load %arg1[%c1024, %c0_62] : memref<1792x128xbf16, #tpu.memory_space<vmem>>, vector<128x128xbf16>
    %cst_63 = arith.constant dense<0.000000e+00> : vector<32x128xf32>
    %170 = tpu.matmul %168, %169, %cst_63 {dimension_numbers = #tpu.dot_dimension_numbers<[1], [0], [0], [1], [0, 0, 1, 1], [], []>} : vector<32x128xbf16>, vector<128x128xbf16>, vector<32x128xf32> -> vector<32x128xf32>
    %c80 = arith.constant 80 : index
    %c0_64 = arith.constant 0 : index
    %171 = vector.load %arg2[%c80, %c0_64] : memref<96x128xf32, #tpu.memory_space<vmem>>, vector<1x128xf32>
    %172 = vector.broadcast %171 : vector<1x128xf32> to vector<32x128xf32>
    %173 = arith.addf %170, %172 : vector<32x128xf32>
    %174 = arith.truncf %136 : vector<32x128xf32> to vector<32x128xbf16>
    %c1152 = arith.constant 1152 : index
    %c0_65 = arith.constant 0 : index
    %175 = vector.load %arg1[%c1152, %c0_65] : memref<1792x128xbf16, #tpu.memory_space<vmem>>, vector<128x128xbf16>
    %cst_66 = arith.constant dense<0.000000e+00> : vector<32x128xf32>
    %176 = tpu.matmul %174, %175, %cst_66 {dimension_numbers = #tpu.dot_dimension_numbers<[1], [0], [0], [1], [0, 0, 1, 1], [], []>} : vector<32x128xbf16>, vector<128x128xbf16>, vector<32x128xf32> -> vector<32x128xf32>
    %c81 = arith.constant 81 : index
    %c0_67 = arith.constant 0 : index
    %177 = vector.load %arg2[%c81, %c0_67] : memref<96x128xf32, #tpu.memory_space<vmem>>, vector<1x128xf32>
    %178 = vector.broadcast %177 : vector<1x128xf32> to vector<32x128xf32>
    %179 = arith.addf %176, %178 : vector<32x128xf32>
    %180 = arith.truncf %167 : vector<16x128xf32> to vector<16x128xbf16>
    %181 = arith.truncf %173 : vector<32x128xf32> to vector<32x128xbf16>
    %cst_68 = arith.constant dense<0.000000e+00> : vector<16x32xf32>
    %182 = tpu.matmul %180, %181, %cst_68 {dimension_numbers = #tpu.dot_dimension_numbers<[1], [1], [0], [0], [0, 0, 1, 0], [], []>} : vector<16x128xbf16>, vector<32x128xbf16>, vector<16x32xf32> -> vector<16x32xf32>
    %183 = arith.addf %182, %1 : vector<16x32xf32>
    %cst_69 = arith.constant dense<0xFF800000> : vector<16xf32>
    %184 = vector.multi_reduction <maximumf>, %183, %cst_69 [1] : vector<16x32xf32> to vector<16xf32>
    %185 = vector.shape_cast %184 : vector<16xf32> to vector<16x1xf32>
    %186 = vector.broadcast %185 : vector<16x1xf32> to vector<16x32xf32>
    %187 = arith.subf %183, %186 : vector<16x32xf32>
    %188 = math.exp %187 : vector<16x32xf32>
    %cst_70 = arith.constant dense<0.000000e+00> : vector<16xf32>
    %189 = vector.multi_reduction <add>, %188, %cst_70 [1] : vector<16x32xf32> to vector<16xf32>
    %190 = vector.shape_cast %189 : vector<16xf32> to vector<16x1xf32>
    %191 = arith.truncf %188 : vector<16x32xf32> to vector<16x32xbf16>
    %192 = arith.truncf %179 : vector<32x128xf32> to vector<32x128xbf16>
    %cst_71 = arith.constant dense<0.000000e+00> : vector<16x128xf32>
    %193 = tpu.matmul %191, %192, %cst_71 {dimension_numbers = #tpu.dot_dimension_numbers<[1], [0], [0], [1], [0, 0, 1, 1], [], []>} : vector<16x32xbf16>, vector<32x128xbf16>, vector<16x128xf32> -> vector<16x128xf32>
    %194 = tpu.reciprocal %190 {approx = true} : vector<16x1xf32> -> vector<16x1xf32>
    %195 = vector.broadcast %194 : vector<16x1xf32> to vector<16x128xf32>
    %196 = arith.mulf %193, %195 : vector<16x128xf32>
    %197 = arith.truncf %196 : vector<16x128xf32> to vector<16x128xbf16>
    %c1280 = arith.constant 1280 : index
    %c0_72 = arith.constant 0 : index
    %198 = vector.load %arg1[%c1280, %c0_72] : memref<1792x128xbf16, #tpu.memory_space<vmem>>, vector<128x128xbf16>
    %cst_73 = arith.constant dense<0.000000e+00> : vector<16x128xf32>
    %199 = tpu.matmul %197, %198, %cst_73 {dimension_numbers = #tpu.dot_dimension_numbers<[1], [0], [0], [1], [0, 0, 1, 1], [], []>} : vector<16x128xbf16>, vector<128x128xbf16>, vector<16x128xf32> -> vector<16x128xf32>
    %c82 = arith.constant 82 : index
    %c0_74 = arith.constant 0 : index
    %200 = vector.load %arg2[%c82, %c0_74] : memref<96x128xf32, #tpu.memory_space<vmem>>, vector<1x128xf32>
    %201 = vector.broadcast %200 : vector<1x128xf32> to vector<16x128xf32>
    %202 = arith.addf %199, %201 : vector<16x128xf32>
    %203 = arith.addf %137, %202 : vector<16x128xf32>
    %cst_75 = arith.constant dense<0.000000e+00> : vector<16xf32>
    %204 = vector.multi_reduction <add>, %203, %cst_75 [1] : vector<16x128xf32> to vector<16xf32>
    %205 = vector.shape_cast %204 : vector<16xf32> to vector<16x1xf32>
    %cst_76 = arith.constant 3.125000e-02 : f32
    %206 = vector.broadcast %cst_76 : f32 to vector<16x1xf32>
    %207 = arith.mulf %205, %206 : vector<16x1xf32>
    %208 = arith.mulf %203, %203 : vector<16x128xf32>
    %cst_77 = arith.constant dense<0.000000e+00> : vector<16xf32>
    %209 = vector.multi_reduction <add>, %208, %cst_77 [1] : vector<16x128xf32> to vector<16xf32>
    %210 = vector.shape_cast %209 : vector<16xf32> to vector<16x1xf32>
    %cst_78 = arith.constant 3.125000e-02 : f32
    %211 = vector.broadcast %cst_78 : f32 to vector<16x1xf32>
    %212 = arith.mulf %210, %211 : vector<16x1xf32>
    %213 = arith.mulf %207, %207 : vector<16x1xf32>
    %214 = arith.subf %212, %213 : vector<16x1xf32>
    %cst_79 = arith.constant 9.99999974E-6 : f32
    %215 = vector.broadcast %cst_79 : f32 to vector<16x1xf32>
    %216 = arith.addf %214, %215 : vector<16x1xf32>
    %217 = math.rsqrt %216 : vector<16x1xf32>
    %218 = vector.broadcast %207 : vector<16x1xf32> to vector<16x128xf32>
    %219 = arith.subf %203, %218 : vector<16x128xf32>
    %220 = vector.broadcast %217 : vector<16x1xf32> to vector<16x128xf32>
    %221 = arith.mulf %219, %220 : vector<16x128xf32>
    %c83 = arith.constant 83 : index
    %c0_80 = arith.constant 0 : index
    %222 = vector.load %arg2[%c83, %c0_80] : memref<96x128xf32, #tpu.memory_space<vmem>>, vector<1x128xf32>
    %223 = vector.broadcast %222 : vector<1x128xf32> to vector<16x128xf32>
    %224 = arith.mulf %221, %223 : vector<16x128xf32>
    %c84 = arith.constant 84 : index
    %c0_81 = arith.constant 0 : index
    %225 = vector.load %arg2[%c84, %c0_81] : memref<96x128xf32, #tpu.memory_space<vmem>>, vector<1x128xf32>
    %226 = vector.broadcast %225 : vector<1x128xf32> to vector<16x128xf32>
    %227 = arith.addf %224, %226 : vector<16x128xf32>
    %228 = arith.truncf %227 : vector<16x128xf32> to vector<16x128xbf16>
    %c1408 = arith.constant 1408 : index
    %c0_82 = arith.constant 0 : index
    %229 = vector.load %arg1[%c1408, %c0_82] : memref<1792x128xbf16, #tpu.memory_space<vmem>>, vector<128x128xbf16>
    %cst_83 = arith.constant dense<0.000000e+00> : vector<16x128xf32>
    %230 = tpu.matmul %228, %229, %cst_83 {dimension_numbers = #tpu.dot_dimension_numbers<[1], [0], [0], [1], [0, 0, 1, 1], [], []>} : vector<16x128xbf16>, vector<128x128xbf16>, vector<16x128xf32> -> vector<16x128xf32>
    %c85 = arith.constant 85 : index
    %c0_84 = arith.constant 0 : index
    %231 = vector.load %arg2[%c85, %c0_84] : memref<96x128xf32, #tpu.memory_space<vmem>>, vector<1x128xf32>
    %232 = vector.broadcast %231 : vector<1x128xf32> to vector<16x128xf32>
    %233 = arith.addf %230, %232 : vector<16x128xf32>
    %cst_85 = arith.constant 0.000000e+00 : f32
    %234 = vector.broadcast %cst_85 : f32 to vector<16x128xf32>
    %235 = arith.maximumf %233, %234 : vector<16x128xf32>
    %236 = arith.truncf %235 : vector<16x128xf32> to vector<16x128xbf16>
    %c1536 = arith.constant 1536 : index
    %c0_86 = arith.constant 0 : index
    %237 = vector.load %arg1[%c1536, %c0_86] : memref<1792x128xbf16, #tpu.memory_space<vmem>>, vector<128x128xbf16>
    %cst_87 = arith.constant dense<0.000000e+00> : vector<16x128xf32>
    %238 = tpu.matmul %236, %237, %cst_87 {dimension_numbers = #tpu.dot_dimension_numbers<[1], [0], [0], [1], [0, 0, 1, 1], [], []>} : vector<16x128xbf16>, vector<128x128xbf16>, vector<16x128xf32> -> vector<16x128xf32>
    %c86 = arith.constant 86 : index
    %c0_88 = arith.constant 0 : index
    %239 = vector.load %arg2[%c86, %c0_88] : memref<96x128xf32, #tpu.memory_space<vmem>>, vector<1x128xf32>
    %240 = vector.broadcast %239 : vector<1x128xf32> to vector<16x128xf32>
    %241 = arith.addf %238, %240 : vector<16x128xf32>
    %242 = arith.addf %203, %241 : vector<16x128xf32>
    %cst_89 = arith.constant dense<0.000000e+00> : vector<16xf32>
    %243 = vector.multi_reduction <add>, %242, %cst_89 [1] : vector<16x128xf32> to vector<16xf32>
    %244 = vector.shape_cast %243 : vector<16xf32> to vector<16x1xf32>
    %cst_90 = arith.constant 3.125000e-02 : f32
    %245 = vector.broadcast %cst_90 : f32 to vector<16x1xf32>
    %246 = arith.mulf %244, %245 : vector<16x1xf32>
    %247 = arith.mulf %242, %242 : vector<16x128xf32>
    %cst_91 = arith.constant dense<0.000000e+00> : vector<16xf32>
    %248 = vector.multi_reduction <add>, %247, %cst_91 [1] : vector<16x128xf32> to vector<16xf32>
    %249 = vector.shape_cast %248 : vector<16xf32> to vector<16x1xf32>
    %cst_92 = arith.constant 3.125000e-02 : f32
    %250 = vector.broadcast %cst_92 : f32 to vector<16x1xf32>
    %251 = arith.mulf %249, %250 : vector<16x1xf32>
    %252 = arith.mulf %246, %246 : vector<16x1xf32>
    %253 = arith.subf %251, %252 : vector<16x1xf32>
    %cst_93 = arith.constant 9.99999974E-6 : f32
    %254 = vector.broadcast %cst_93 : f32 to vector<16x1xf32>
    %255 = arith.addf %253, %254 : vector<16x1xf32>
    %256 = math.rsqrt %255 : vector<16x1xf32>
    %257 = vector.broadcast %246 : vector<16x1xf32> to vector<16x128xf32>
    %258 = arith.subf %242, %257 : vector<16x128xf32>
    %259 = vector.broadcast %256 : vector<16x1xf32> to vector<16x128xf32>
    %260 = arith.mulf %258, %259 : vector<16x128xf32>
    %c87 = arith.constant 87 : index
    %c0_94 = arith.constant 0 : index
    %261 = vector.load %arg2[%c87, %c0_94] : memref<96x128xf32, #tpu.memory_space<vmem>>, vector<1x128xf32>
    %262 = vector.broadcast %261 : vector<1x128xf32> to vector<16x128xf32>
    %263 = arith.mulf %260, %262 : vector<16x128xf32>
    %c88 = arith.constant 88 : index
    %c0_95 = arith.constant 0 : index
    %264 = vector.load %arg2[%c88, %c0_95] : memref<96x128xf32, #tpu.memory_space<vmem>>, vector<1x128xf32>
    %265 = vector.broadcast %264 : vector<1x128xf32> to vector<16x128xf32>
    %266 = arith.addf %263, %265 : vector<16x128xf32>
    %267 = arith.truncf %266 : vector<16x128xf32> to vector<16x128xbf16>
    %c1664 = arith.constant 1664 : index
    %c0_96 = arith.constant 0 : index
    %268 = vector.load %arg1[%c1664, %c0_96] : memref<1792x128xbf16, #tpu.memory_space<vmem>>, vector<128x128xbf16>
    %cst_97 = arith.constant dense<0.000000e+00> : vector<16x128xf32>
    %269 = tpu.matmul %267, %268, %cst_97 {dimension_numbers = #tpu.dot_dimension_numbers<[1], [0], [0], [1], [0, 0, 1, 1], [], []>} : vector<16x128xbf16>, vector<128x128xbf16>, vector<16x128xf32> -> vector<16x128xf32>
    %c89 = arith.constant 89 : index
    %c0_98 = arith.constant 0 : index
    %270 = vector.load %arg2[%c89, %c0_98] : memref<96x128xf32, #tpu.memory_space<vmem>>, vector<1x128xf32>
    %271 = vector.broadcast %270 : vector<1x128xf32> to vector<16x128xf32>
    %272 = arith.addf %269, %271 : vector<16x128xf32>
    %273 = tpu.iota {dimensions = array<i32: 1>} : vector<16x128xi32>
    %c5_i32 = arith.constant 5 : i32
    %274 = vector.broadcast %c5_i32 : i32 to vector<16x128xi32>
    %275 = arith.cmpi sge, %273, %274 : vector<16x128xi32>
    %c9_i32 = arith.constant 9 : i32
    %276 = vector.broadcast %c9_i32 : i32 to vector<16x128xi32>
    %277 = arith.cmpi slt, %273, %276 : vector<16x128xi32>
    %278 = arith.andi %275, %277 : vector<16x128xi1>
    %279 = arith.negf %272 : vector<16x128xf32>
    %280 = math.exp %279 : vector<16x128xf32>
    %cst_99 = arith.constant 1.000000e+00 : f32
    %281 = vector.broadcast %cst_99 : f32 to vector<16x128xf32>
    %282 = arith.addf %281, %280 : vector<16x128xf32>
    %283 = arith.divf %281, %282 : vector<16x128xf32>
    %284 = arith.select %278, %283, %272 : vector<16x128xi1>, vector<16x128xf32>
    %c0_100 = arith.constant 0 : index
    %c0_101 = arith.constant 0 : index
    %285 = vector.load %arg3[%c0_100, %c0_101] : memref<16x128xf32, #tpu.memory_space<vmem>>, vector<16x128xf32>
    tpu.vector_store %arg3[%c0_100, %c0_101], %284 {strides = array<i32>} : memref<16x128xf32, #tpu.memory_space<vmem>>, vector<16x128xf32>,
    return
  }
}

</mosaic_0001>

<bundles_post_ra>
// kernel: linea_forward.1
= control target key start
LH: loop header
LB: loop body
LE: loop exit
PB: predicated region body
PF: predicated region fallthrough
CT: control target
= control target key end

     0   :  { %vm634_vm0 = vcmask 261120   ;;  %vm3100_vm1 = vmmov 0   ;;  %s3760_s1 = inlined_call_operand.vmem [shape: bf16[1792,128], index: 1, kind: input, shape index: {}]   ;;  %s3761_s0 = inlined_call_operand.vmem [shape: bf16[32,128], index: 0, kind: input, shape index: {}]   ;;  %s3762_s2 = inlined_call_operand.vmem [shape: f32[96,128], index: 2, kind: input, shape index: {}]   ;;  %s3763_s3 = inlined_call_operand.vmem [shape: f32[16,128], index: 3, kind: output, shape index: {}]  }
   0x1   :  { %v2917_v0 = vld [vmem:[%s3760_s1] sm:$0xff]   ;;  %v2918_v1 = vld [vmem:[%s3760_s1 + $0x8] sm:$0xff]   ;;  %v2919_v2 = vld [vmem:[%s3760_s1 + $0x10] sm:$0xff]  }
   0x2   :  { %2603 = vmatprep.subr.bf16.mxu0 %v2917_v0  ;;  %v2920_v3 = vld [vmem:[%s3760_s1 + $0x18] sm:$0xff]   ;;  %v2925_v4 = vld [vmem:[%s3761_s0] sm:$0xff]   ;;  %v2922_v6 = vld [vmem:[%s3760_s1 + $0x28] sm:$0xff]  }
   0x3   :  { %2604 = vmatpush3.bf16.msra.mxu0 %v2917_v0  ;;  %v2921_v5 = vld [vmem:[%s3760_s1 + $0x20] sm:$0xff]   ;;  %2619 = vmatprep.mubr.bf16.mxu0 %v2925_v4  ;;  %v2923_v7 = vld [vmem:[%s3760_s1 + $0x30] sm:$0xff]   ;;  %v2924_v8 = vld [vmem:[%s3760_s1 + $0x38] sm:$0xff]  }
   0x4   :  { %2605 = vmatprep.subr.bf16.mxu0 %v2918_v1  ;;  %v2926_v9 = vld [vmem:[%s3761_s0 + $0x8] sm:$0xff]   ;;  %v2309_v10 = vld [vmem:[%s3762_s2 + $0x40] ss:$0 sm:$0xff]  ;;  %v2931_v27 = vld [vmem:[%s3760_s1 + $0x50] sm:$0xff]  }
   0x5   :  { %v2927_v23 = vld [vmem:[%s3760_s1 + $0x40] sm:$0xff]   ;;  %v2929_v25 = vld [vmem:[%s3760_s1 + $0x48] sm:$0xff]   ;;  %v2932_v28 = vld [vmem:[%s3760_s1 + $0x90] sm:$0xff]  }
   0x6   :  { %v2928_v24 = vld [vmem:[%s3760_s1 + $0x80] sm:$0xff]   ;;  %2623 = vmatprep.subr.bf16.mxu1 %v2927_v23  ;;  %v2930_v26 = vld [vmem:[%s3760_s1 + $0x88] sm:$0xff]   ;;  %v2933_v29 = vld [vmem:[%s3760_s1 + $0x58] sm:$0xff]  }
   0x7   :  { %2606 = vmatpush3.bf16.msra.mxu0 %v2918_v1  ;;  %2624 = vmatpush3.bf16.msra.mxu1 %v2927_v23  ;;  %v2934_v30 = vld [vmem:[%s3760_s1 + $0x98] sm:$0xff]   ;;  %v2935_v31 = vld [vmem:[%s3760_s1 + $0x60] sm:$0xff]   ;;  %v2937_v33 = vld [vmem:[%s3760_s1 + $0x68] sm:$0xff]  }
   0x8   :  { %2607 = vmatprep.subr.bf16.mxu0 %v2919_v2  ;;  %2625 = vmatprep.subr.bf16.mxu1 %v2929_v25  ;;  %v2936_v32 = vld [vmem:[%s3760_s1 + $0xa0] sm:$0xff]   ;;  %v2938_v34 = vld [vmem:[%s3760_s1 + $0xa8] sm:$0xff]   ;;  %v2939_v35 = vld [vmem:[%s3760_s1 + $0x70] sm:$0xff]  }
   0x9   :  { %v2940_v36 = vld [vmem:[%s3760_s1 + $0xb0] sm:$0xff]   ;;  %v2941_v37 = vld [vmem:[%s3760_s1 + $0x78] sm:$0xff]   ;;  %v3225_v39 = vld [vmem:[%s3760_s1 + $0xc0] sm:$0xff]  }
   0xa   :  { %v2942_v38 = vld [vmem:[%s3760_s1 + $0xb8] sm:$0xff]  }
   0xb   :  { %2608 = vmatpush3.bf16.msra.mxu0 %v2919_v2  ;;  %2626 = vmatpush3.bf16.msra.mxu1 %v2929_v25 }
   0xc   :  { %2609 = vmatprep.subr.bf16.mxu0 %v2920_v3  ;;  %2627 = vmatprep.subr.bf16.mxu1 %v2931_v27 }
   0xf   :  { %2610 = vmatpush3.bf16.msra.mxu0 %v2920_v3  ;;  %2628 = vmatpush3.bf16.msra.mxu1 %v2931_v27 }
  0x10   :  { %2611 = vmatprep.subr.bf16.mxu0 %v2921_v5  ;;  %2629 = vmatprep.subr.bf16.mxu1 %v2933_v29 }
  0x13   :  { %2612 = vmatpush3.bf16.msra.mxu0 %v2921_v5  ;;  %2630 = vmatpush3.bf16.msra.mxu1 %v2933_v29 }
  0x14   :  { %2613 = vmatprep.subr.bf16.mxu0 %v2922_v6  ;;  %2631 = vmatprep.subr.bf16.mxu1 %v2935_v31 }
  0x17   :  { %2614 = vmatpush3.bf16.msra.mxu0 %v2922_v6  ;;  %2632 = vmatpush3.bf16.msra.mxu1 %v2935_v31 }
  0x18   :  { %2615 = vmatprep.subr.bf16.mxu0 %v2923_v7  ;;  %2633 = vmatprep.subr.bf16.mxu1 %v2937_v33 }
  0x1b   :  { %2616 = vmatpush3.bf16.msra.mxu0 %v2923_v7  ;;  %2634 = vmatpush3.bf16.msra.mxu1 %v2937_v33  ;;  %v2320_v7 = vld [vmem:[%s3762_s2 + $0x41] ss:$0 sm:$0xff]  ;;  %v2945_v33 = vld [vmem:[%s3760_s1 + $0xd0] sm:$0xff]  }
  0x1c   :  { %2617 = vmatprep.subr.bf16.mxu0 %v2924_v8  ;;  %2635 = vmatprep.subr.bf16.mxu1 %v2939_v35 }
  0x1f   :  { %2618 = vmatpush3.bf16.msra.mxu0 %v2924_v8  ;;  %2636 = vmatpush3.bf16.msra.mxu1 %v2939_v35  ;;  %v2947_v35 = vld [vmem:[%s3760_s1 + $0xe0] sm:$0xff]  }
  0x20   :  { %2643 = vmatprep.subr.bf16.mxu0 %v2928_v24  ;;  %2637 = vmatprep.subr.bf16.mxu1 %v2941_v37 }
  0x22   :  { %2620 = vmatmul.mubr.bf16.vlgmr.msra.gmra.mrb[0].mxu0 %v2926_v9 }
  0x23   :  { %2644 = vmatpush3.bf16.msra.mxu0 %v2928_v24  ;;  %2638 = vmatpush3.bf16.msra.mxu1 %v2941_v37  ;;  %v2949_v37 = vld [vmem:[%s3760_s1 + $0xf0] sm:$0xff]  }
  0x24   :  { %2645 = vmatprep.subr.bf16.mxu0 %v2930_v26  ;;  %2663 = vmatprep.subr.bf16.mxu1 %v3225_v39 }
  0x27   :  { %2646 = vmatpush3.bf16.msra.mxu0 %v2930_v26 }
  0x28   :  { %2647 = vmatprep.subr.bf16.mxu0 %v2932_v28 }
  0x2b   :  { %2648 = vmatpush3.bf16.msra.mxu0 %v2932_v28 }
  0x2c   :  { %2649 = vmatprep.subr.bf16.mxu0 %v2934_v30 }
  0x2f   :  { %2650 = vmatpush3.bf16.msra.mxu0 %v2934_v30 }
  0x30   :  { %2651 = vmatprep.subr.bf16.mxu0 %v2936_v32 }
  0x33   :  { %2652 = vmatpush3.bf16.msra.mxu0 %v2936_v32  ;;  %v2944_v32 = vld [vmem:[%s3760_s1 + $0xc8] sm:$0xff]  }
  0x34   :  { %2653 = vmatprep.subr.bf16.mxu0 %v2938_v34 }
  0x37   :  { %2654 = vmatpush3.bf16.msra.mxu0 %v2938_v34  ;;  %v2946_v34 = vld [vmem:[%s3760_s1 + $0xd8] sm:$0xff]  }
  0x38   :  { %2655 = vmatprep.subr.bf16.mxu0 %v2940_v36 }
  0x3b   :  { %2656 = vmatpush3.bf16.msra.mxu0 %v2940_v36  ;;  %v2948_v36 = vld [vmem:[%s3760_s1 + $0xe8] sm:$0xff]  }
  0x3c   :  { %2657 = vmatprep.subr.bf16.mxu0 %v2942_v38 }
  0x3f   :  { %2658 = vmatpush3.bf16.msra.mxu0 %v2942_v38  ;;  %v2950_v38 = vld [vmem:[%s3760_s1 + $0xf8] sm:$0xff]  }
  0xf5   :  { %v2621_v11 = vpop.f32.mrb[0].mxu0 }
  0xf6   :  { %v3154_v12 = vadd.f32 %v2621_v11, %v2309_v10  ;;  %v140_v13 = vpop.f32.mrb[1].mxu0  ;;  %v2321_v11 = vld [vmem:[%s3762_s2 + $0x42] ss:$0 sm:$0xff] }
  0xf7   :  { %v3156_v14 = vadd.f32 %v2309_v10, %v140_v13  ;;  %v2622_v15 = vpop.f32.mrb[2].mxu0 }
  0xf8   :  { %159 = vadd.xlane.f32.xlu1 %v3154_v12  ;;  %v143_v16 = vpop.f32.mrb[3].mxu0  ;;  %v3160_v17 = vadd.f32 %v2622_v15, %v2309_v10  ;;  %v169_v22 = vmul.f32 %v3154_v12, %v3154_v12 }
  0xf9   :  { %155 = vadd.xlane.f32.xlu0 %v3156_v14  ;;  %v3162_v18 = vadd.f32 %v2309_v10, %v143_v16  ;;  %v167_v20 = vmul.f32 %v3156_v14, %v3156_v14 }
  0xfa   :  { %v170_v21 = vmul.f32 %v3160_v17, %v3160_v17 }
  0xfb   :  { %v168_v19 = vmul.f32 %v3162_v18, %v3162_v18 }
  0xfc   :  { %161 = vadd.xlane.f32.xlu1 %v3160_v17 }
  0xfd   :  { %157 = vadd.xlane.f32.xlu0 %v3162_v18 }
 0x100   :  { %173 = vadd.xlane.f32.xlu1 %v168_v19 }
 0x101   :  { %171 = vadd.xlane.f32.xlu0 %v167_v20 }
 0x104   :  { %177 = vadd.xlane.f32.xlu1 %v170_v21 }
 0x105   :  { %175 = vadd.xlane.f32.xlu0 %v169_v22 }
 0x185   :  { %v160_v40 = vpop.xlane.xlu1 %159 }
 0x186   :  { %v156_v41 = vpop.xlane.xlu0 %155  ;;  %v165_v51 = vmul.f32 0.03125, %v160_v40  ;;  %v2322_v40 = vld [vmem:[%s3762_s2 + $0x43] ss:$0 sm:$0xff] }
 0x187   :  { %v163_v44 = vmul.f32 0.03125, %v156_v41 }
 0x188   :  { %v185_v61 = vmul.f32 %v165_v51, %v165_v51  ;;  %v201_v19 = vsub.f32 %v3154_v12, %v165_v51 }
 0x189   :  { %v162_v42 = vpop.xlane.xlu1 %161  ;;  %v183_v52 = vmul.f32 %v163_v44, %v163_v44  ;;  %v199_v6 = vsub.f32 %v3156_v14, %v163_v44 }
 0x18a   :  { %v158_v43 = vpop.xlane.xlu0 %157  ;;  %v166_v48 = vmul.f32 0.03125, %v162_v42  ;;  %v2331_v42 = vld [vmem:[%s3762_s2 + $0x44] ss:$0 sm:$0xff] }
 0x18b   :  { %v164_v45 = vmul.f32 0.03125, %v158_v43 }
 0x18c   :  { %v186_v57 = vmul.f32 %v166_v48, %v166_v48  ;;  %v202_v13 = vsub.f32 %v3160_v17, %v166_v48 }
 0x18d   :  { %v184_v46 = vmul.f32 %v164_v45, %v164_v45  ;;  %v174_v47 = vpop.xlane.xlu1 %173  ;;  %v200_v4 = vsub.f32 %v3162_v18, %v164_v45 }
 0x18e   :  { %v180_v49 = vmul.f32 0.03125, %v174_v47  ;;  %v172_v50 = vpop.xlane.xlu0 %171 }
 0x18f   :  { %v179_v53 = vmul.f32 0.03125, %v172_v50 }
 0x190   :  { %v188_v54 = vsub.f32 %v180_v49, %v184_v46 }
 0x191   :  { %v187_v55 = vsub.f32 %v179_v53, %v183_v52  ;;  %v178_v56 = vpop.xlane.xlu1 %177 }
 0x192   :  { %v192_v58 = vadd.f32 1e-05, %v188_v54  ;;  %v182_v59 = vmul.f32 0.03125, %v178_v56  ;;  %v176_v60 = vpop.xlane.xlu0 %175 }
 0x193   :  { %v191_v62 = vadd.f32 1e-05, %v187_v55  ;;  %v181_v63 = vmul.f32 0.03125, %v176_v60 }
 0x194   :  { %3031 = vrsqrt.f32 %v192_v58  ;;  %v190_v0 = vsub.f32 %v182_v59, %v186_v57 }
 0x195   :  { %3033 = vrsqrt.f32 %v191_v62  ;;  %v189_v1 = vsub.f32 %v181_v63, %v185_v61  ;;  %v2340_v62 = vld [vmem:[%s3762_s2 + $0x45] ss:$0 sm:$0xff] }
 0x196   :  { %v194_v2 = vadd.f32 1e-05, %v190_v0 }
 0x197   :  { %v193_v3 = vadd.f32 1e-05, %v189_v1 }
 0x198   :  { %3035 = vrsqrt.f32 %v194_v2 }
 0x199   :  { %3037 = vrsqrt.f32 %v193_v3 }
 0x19e   :  { %v3032_v5 = vpop.eup %3031 }
 0x19f   :  { %v3034_v8 = vpop.eup %3033  ;;  %v204_v9 = vmul.f32 %v3032_v5, %v200_v4 }
 0x1a0   :  { %v203_v10 = vmul.f32 %v3034_v8, %v199_v6  ;;  %v15_v8 = vld [vmem:[%s3762_s2 + $0x10] sm:$0xff] }
 0x1a1   :  { %v213_v15 = vmul.f32 %v2320_v7, %v204_v9 }
 0x1a2   :  { %v3036_v16 = vpop.eup %3035  ;;  %v212_v20 = vmul.f32 %v2320_v7, %v203_v10  ;;  %v17_v10 = vld [vmem:[%s3762_s2 + $0x20] sm:$0xff] }
 0x1a3   :  { %v3038_v21 = vpop.eup %3037  ;;  %v222_v22 = vadd.f32 %v2321_v11, %v213_v15  ;;  %v206_v23 = vmul.f32 %v3036_v16, %v202_v13  ;;  %v16_v13 = vld [vmem:[%s3762_s2 + $0x18] sm:$0xff] }
 0x1a4   :  { %v221_v24 = vadd.f32 %v2321_v11, %v212_v20  ;;  %v205_v25 = vmul.f32 %v3038_v21, %v201_v19  ;;  %v18_v19 = vld [vmem:[%s3762_s2 + $0x28] sm:$0xff] }
 0x1a5   :  { %v215_v26 = vmul.f32 %v2320_v7, %v206_v23 }
 0x1a6   :  { %v225_v27 = vpack.c.bf16 %v222_v22, %v221_v24  ;;  %v214_v28 = vmul.f32 %v2320_v7, %v205_v25 }
 0x1a7   :  { %v224_v29 = vadd.f32 %v2321_v11, %v215_v26 }
 0x1a8   :  { %2639 = vmatprep.mubr.bf16.mxu1 %v225_v27  ;;  %2659 = vmatprep.mubr.bf16.mxu0 %v225_v27  ;;  %v223_v30 = vadd.f32 %v2321_v11, %v214_v28 }
 0x1aa   :  { %v226_v31 = vpack.c.bf16 %v224_v29, %v223_v30 }
 0x1ac   :  { %2640 = vmatmul.mubr.bf16.vlgmr.msra.gmra.mrb[0].mxu1 %v226_v31  ;;  %2660 = vmatmul.mubr.bf16.vlgmr.msra.gmra.mrb[4].mxu0 %v226_v31 }
 0x1ad   :  { %2664 = vmatpush3.bf16.msra.mxu1 %v3225_v39  ;;  %2679 = vmatprep.mubr.bf16.mxu1 %v225_v27 }
 0x1ae   :  { %2665 = vmatprep.subr.bf16.mxu1 %v2944_v32 }
 0x1b1   :  { %2666 = vmatpush3.bf16.msra.mxu1 %v2944_v32 }
 0x1b2   :  { %2667 = vmatprep.subr.bf16.mxu1 %v2945_v33 }
 0x1b5   :  { %2668 = vmatpush3.bf16.msra.mxu1 %v2945_v33 }
 0x1b6   :  { %2669 = vmatprep.subr.bf16.mxu1 %v2946_v34 }
 0x1b9   :  { %2670 = vmatpush3.bf16.msra.mxu1 %v2946_v34 }
 0x1ba   :  { %2671 = vmatprep.subr.bf16.mxu1 %v2947_v35 }
 0x1bd   :  { %2672 = vmatpush3.bf16.msra.mxu1 %v2947_v35 }
 0x1be   :  { %2673 = vmatprep.subr.bf16.mxu1 %v2948_v36 }
 0x1c1   :  { %2674 = vmatpush3.bf16.msra.mxu1 %v2948_v36 }
 0x1c2   :  { %2675 = vmatprep.subr.bf16.mxu1 %v2949_v37 }
 0x1c5   :  { %2676 = vmatpush3.bf16.msra.mxu1 %v2949_v37 }
 0x1c6   :  { %2677 = vmatprep.subr.bf16.mxu1 %v2950_v38 }
 0x1c9   :  { %2678 = vmatpush3.bf16.msra.mxu1 %v2950_v38 }
 0x1cc   :  { %2680 = vmatmul.mubr.bf16.vlgmr.msra.gmra.mrb[4].mxu1 %v226_v31 }
 0x27f   :  { %v2641_v39 = vpop.f32.mrb[0].mxu1  ;;  %v2661_v41 = vpop.f32.mrb[4].mxu0 }
 0x280   :  { %v330_v43 = vpop.f32.mrb[1].mxu1  ;;  %v448_v44 = vpop.f32.mrb[5].mxu0  ;;  %v339_v47 = vadd.f32 %v2641_v39, %v2322_v40  ;;  %v457_v48 = vadd.f32 %v2661_v41, %v2331_v42 }
 0x281   :  { %v2642_v45 = vpop.f32.mrb[2].mxu1  ;;  %v2662_v46 = vpop.f32.mrb[6].mxu0  ;;  %v331_v53 = vadd.f32 %v2322_v40, %v330_v43  ;;  %v449_v54 = vadd.f32 %v2331_v42, %v448_v44 }
 0x282   :  { %v342_v49 = vadd.f32 %v2642_v45, %v2322_v40  ;;  %v460_v50 = vadd.f32 %v2662_v46, %v2331_v42  ;;  %v333_v51 = vpop.f32.mrb[3].mxu1  ;;  %v451_v52 = vpop.f32.mrb[7].mxu0 }
 0x283   :  { %v334_v55 = vadd.f32 %v2322_v40, %v333_v51  ;;  %v452_v56 = vadd.f32 %v2331_v42, %v451_v52  ;;  %v2952_v51 = vld [vmem:[%s3760_s1 + $0x108] sm:$0xff]   ;;  %v2953_v52 = vld [vmem:[%s3760_s1 + $0x110] sm:$0xff]  }
 0x284   :  { %v582_v57 = vpack.c.bf16 %v342_v49, %v339_v47  ;;  %v584_v58 = vpack.c.bf16 %v460_v50, %v457_v48  ;;  %v2951_v50 = vld [vmem:[%s3760_s1 + $0x100] sm:$0xff]  }
 0x285   :  { %v581_v59 = vpack.c.bf16 %v334_v55, %v331_v53  ;;  %v583_v60 = vpack.c.bf16 %v452_v56, %v449_v54  ;;  %v2954_v53 = vld [vmem:[%s3760_s1 + $0x118] sm:$0xff]   ;;  %v2955_v54 = vld [vmem:[%s3760_s1 + $0x120] sm:$0xff]   ;;  %v2956_v55 = vld [vmem:[%s3760_s1 + $0x128] sm:$0xff]  }
 0x286   :  { %v2957_v56 = vld [vmem:[%s3760_s1 + $0x130] sm:$0xff]  }
 0x287   :  { %2683 = vmatprep.subr.bf16.mxu0 %v583_v60  ;;  %2687 = vmatprep.mubr.bf16.mxu0 %v581_v59 }
 0x288   :  { %2684 = vmatpush3.bf16.xpose.msra.mxu0 %v583_v60 }
 0x289   :  { %2685 = vmatprep.subr.bf16.mxu0 %v584_v58 }
 0x290   :  { %2686 = vmatpush3.bf16.xpose.msra.mxu0 %v584_v58 }
 0x297   :  { %2688 = vmatmul.mubr.bf16.vlgmr.msra.gmra.mrb[8].mxu0 %v582_v57  ;;  %v2958_v57 = vld [vmem:[%s3760_s1 + $0x138] sm:$0xff]  }
 0x29f   :  { %v2681_v61 = vpop.f32.mrb[4].mxu1 }
 0x2a0   :  { %v566_v63 = vpop.f32.mrb[5].mxu1  ;;  %v575_v1 = vadd.f32 %v2681_v61, %v2340_v62 }
 0x2a1   :  { %v2682_v0 = vpop.f32.mrb[6].mxu1  ;;  %v567_v4 = vadd.f32 %v2340_v62, %v566_v63 }
 0x2a2   :  { %v578_v2 = vadd.f32 %v2682_v0, %v2340_v62  ;;  %v569_v3 = vpop.f32.mrb[7].mxu1 }
 0x2a3   :  { %v570_v5 = vadd.f32 %v2340_v62, %v569_v3 }
 0x2a4   :  { %v674_v6 = vpack.c.bf16 %v578_v2, %v575_v1 }
 0x2a5   :  { %v673_v7 = vpack.c.bf16 %v570_v5, %v567_v4 }
 0x2a7   :  { %2691 = vmatprep.subr.bf16.mxu1 %v673_v7 }
 0x2a8   :  { %2692 = vmatpush3.bf16.msra.mxu1 %v673_v7 }
 0x2a9   :  { %2693 = vmatprep.subr.bf16.mxu1 %v674_v6 }
 0x2ac   :  { %2694 = vmatpush3.bf16.msra.mxu1 %v674_v6 }
 0x2ad   :  { %2699 = vmatprep.subr.bf16.mxu1 %v2951_v50 }
 0x36a   :  { %v2689_v9 = vpop.f32.mrb[8].mxu0 }
 0x36b   :  { %v619_v11 = vpop.f32.mrb[9].mxu0  ;;  %v628_v21 = vadd.f32 %v2689_v9, %v17_v10 }
 0x36c   :  { %v620_v15 = vadd.f32 %v619_v11, %v15_v8  ;;  %v2690_v16 = vpop.f32.mrb[10].mxu0 }
 0x36d   :  { %v622_v20 = vpop.f32.mrb[11].mxu0  ;;  %v631_v24 = vadd.f32 %v2690_v16, %v18_v19  ;;  %v641_v26 = vsel %vm634_vm0, %v628_v21, -inf }
 0x36e   :  { %v623_v22 = vadd.f32 %v622_v20, %v16_v13  ;;  %v635_v23 = vsel %vm634_vm0, %v620_v15, -inf  ;;  %v2351_v13 = vld [vmem:[%s3762_s2 + $0x46] ss:$0 sm:$0xff] }
 0x36f   :  { %636 = vmax.xlane.f32.xlu0 %v635_v23  ;;  %v644_v27 = vsel %vm634_vm0, %v631_v24, -inf }
 0x370   :  { %v638_v25 = vsel %vm634_vm0, %v623_v22, -inf }
 0x371   :  { %639 = vmax.xlane.f32.xlu1 %v638_v25 }
 0x373   :  { %642 = vmax.xlane.f32.xlu0 %v641_v26 }
 0x375   :  { %645 = vmax.xlane.f32.xlu1 %v644_v27 }
 0x3fc   :  { %v637_v28 = vpop.xlane.xlu0 %636 }
 0x3fd   :  { %v647_v29 = vsub.f32 %v620_v15, %v637_v28 }
 0x3fe   :  { %v640_v30 = vpop.xlane.xlu1 %639 }
 0x3ff   :  { %v651_v31 = vmul.f32 1.442695, %v647_v29  ;;  %v648_v32 = vsub.f32 %v623_v22, %v640_v30  ;;  %v2959_v29 = vld [vmem:[%s3760_s1 + $0x140] sm:$0xff]   ;;  %v2960_v30 = vld [vmem:[%s3760_s1 + $0x148] sm:$0xff]  }
 0x400   :  { %v643_v33 = vpop.xlane.xlu0 %642  ;;  %2719 = vmatprep.subr.bf16.mxu0 %v2959_v29 }
 0x401   :  { %3039 = vpow2.f32 %v651_v31  ;;  %v653_v34 = vmul.f32 1.442695, %v648_v32  ;;  %v649_v35 = vsub.f32 %v628_v21, %v643_v33  ;;  %2720 = vmatpush3.bf16.msra.mxu0 %v2959_v29  ;;  %v2961_v31 = vld [vmem:[%s3760_s1 + $0x150] sm:$0xff]   ;;  %v2962_v32 = vld [vmem:[%s3760_s1 + $0x158] sm:$0xff]   ;;  %v2963_v33 = vld [vmem:[%s3760_s1 + $0x160] sm:$0xff]  }
 0x402   :  { %v646_v36 = vpop.xlane.xlu1 %645  ;;  %2721 = vmatprep.subr.bf16.mxu0 %v2960_v30 }
 0x403   :  { %3041 = vpow2.f32 %v653_v34  ;;  %v655_v37 = vmul.f32 1.442695, %v649_v35  ;;  %v650_v38 = vsub.f32 %v631_v24, %v646_v36  ;;  %v2964_v34 = vld [vmem:[%s3760_s1 + $0x168] sm:$0xff]   ;;  %v2965_v35 = vld [vmem:[%s3760_s1 + $0x170] sm:$0xff]   ;;  %v2966_v36 = vld [vmem:[%s3760_s1 + $0x178] sm:$0xff]  }
 0x405   :  { %3043 = vpow2.f32 %v655_v37  ;;  %v657_v39 = vmul.f32 1.442695, %v650_v38  ;;  %2722 = vmatpush3.bf16.msra.mxu0 %v2960_v30  ;;  %v2967_v37 = vld [vmem:[%s3760_s1 + $0x180] sm:$0xff]   ;;  %v2968_v38 = vld [vmem:[%s3760_s1 + $0x188] sm:$0xff]  }
 0x406   :  { %2723 = vmatprep.subr.bf16.mxu0 %v2961_v31 }
 0x407   :  { %3045 = vpow2.f32 %v657_v39  ;;  %v2969_v39 = vld [vmem:[%s3760_s1 + $0x190] sm:$0xff]  }
 0x409   :  { %2724 = vmatpush3.bf16.msra.mxu0 %v2961_v31 }
 0x40a   :  { %2725 = vmatprep.subr.bf16.mxu0 %v2962_v32 }
 0x40b   :  { %v3040_v40 = vpop.eup %3039 }
 0x40c   :  { %v659_v41 = vsel %vm634_vm0, %v3040_v40, 0.0 }
 0x40d   :  { %v3042_v42 = vpop.eup %3041  ;;  %660 = vadd.xlane.f32.xlu0 %v659_v41  ;;  %2726 = vmatpush3.bf16.msra.mxu0 %v2962_v32  ;;  %v2971_v41 = vld [vmem:[%s3760_s1 + $0x1a0] sm:$0xff]  }
 0x40e   :  { %v662_v43 = vsel %vm634_vm0, %v3042_v42, 0.0  ;;  %v671_v44 = vpack.c.bf16 %v3042_v42, %v3040_v40  ;;  %2727 = vmatprep.subr.bf16.mxu0 %v2963_v33  ;;  %v2970_v40 = vld [vmem:[%s3760_s1 + $0x198] sm:$0xff]   ;;  %v2972_v42 = vld [vmem:[%s3760_s1 + $0x1a8] sm:$0xff]  }
 0x40f   :  { %v3044_v45 = vpop.eup %3043  ;;  %663 = vadd.xlane.f32.xlu1 %v662_v43 }
 0x410   :  { %2695 = vmatprep.mubr.msk.bf16.mxu1 %vm634_vm0, %v671_v44  ;;  %v665_v46 = vsel %vm634_vm0, %v3044_v45, 0.0 }
 0x411   :  { %v3046_v47 = vpop.eup %3045  ;;  %666 = vadd.xlane.f32.xlu0 %v665_v46  ;;  %2728 = vmatpush3.bf16.msra.mxu0 %v2963_v33 }
 0x412   :  { %v668_v48 = vsel %vm634_vm0, %v3046_v47, 0.0  ;;  %v672_v49 = vpack.c.bf16 %v3046_v47, %v3044_v45  ;;  %2729 = vmatprep.subr.bf16.mxu0 %v2964_v34 }
 0x413   :  { %669 = vadd.xlane.f32.xlu1 %v668_v48 }
 0x414   :  { %2696 = vmatmul.mubr.msk.bf16.vlgmr.msra.gmra.mrb[8].mxu1 %vm634_vm0, %v672_v49 }
 0x415   :  { %2700 = vmatpush3.bf16.msra.mxu1 %v2951_v50  ;;  %2730 = vmatpush3.bf16.msra.mxu0 %v2964_v34 }
 0x416   :  { %2701 = vmatprep.subr.bf16.mxu1 %v2952_v51  ;;  %2731 = vmatprep.subr.bf16.mxu0 %v2965_v35 }
 0x419   :  { %2702 = vmatpush3.bf16.msra.mxu1 %v2952_v51  ;;  %2732 = vmatpush3.bf16.msra.mxu0 %v2965_v35  ;;  %v2973_v35 = vld [vmem:[%s3760_s1 + $0x1b0] sm:$0xff]  }
 0x41a   :  { %2703 = vmatprep.subr.bf16.mxu1 %v2953_v52  ;;  %2733 = vmatprep.subr.bf16.mxu0 %v2966_v36 }
 0x41d   :  { %2704 = vmatpush3.bf16.msra.mxu1 %v2953_v52  ;;  %2734 = vmatpush3.bf16.msra.mxu0 %v2966_v36  ;;  %v2974_v36 = vld [vmem:[%s3760_s1 + $0x1b8] sm:$0xff]  }
 0x41e   :  { %2705 = vmatprep.subr.bf16.mxu1 %v2954_v53 }
 0x421   :  { %2706 = vmatpush3.bf16.msra.mxu1 %v2954_v53 }
 0x422   :  { %2707 = vmatprep.subr.bf16.mxu1 %v2955_v54 }
 0x425   :  { %2708 = vmatpush3.bf16.msra.mxu1 %v2955_v54 }
 0x426   :  { %2709 = vmatprep.subr.bf16.mxu1 %v2956_v55 }
 0x429   :  { %2710 = vmatpush3.bf16.msra.mxu1 %v2956_v55 }
 0x42a   :  { %2711 = vmatprep.subr.bf16.mxu1 %v2957_v56 }
 0x42d   :  { %2712 = vmatpush3.bf16.msra.mxu1 %v2957_v56 }
 0x42e   :  { %2713 = vmatprep.subr.bf16.mxu1 %v2958_v57 }
 0x431   :  { %2714 = vmatpush3.bf16.msra.mxu1 %v2958_v57 }
 0x432   :  { %2739 = vmatprep.subr.bf16.mxu1 %v2967_v37 }
 0x49a   :  { %v661_v58 = vpop.xlane.xlu0 %660 }
 0x49b   :  { %3047 = vrcp.f32 %v661_v58 }
 0x49c   :  { %v664_v59 = vpop.xlane.xlu1 %663 }
 0x49e   :  { %v667_v60 = vpop.xlane.xlu0 %666 }
 0x49f   :  { %3049 = vrcp.f32 %v667_v60 }
 0x4a0   :  { %v670_v61 = vpop.xlane.xlu1 %669 }
 0x4a1   :  { %3051 = vrcp.f32 %v670_v61 }
 0x4a2   :  { %3053 = vrcp.f32 %v664_v59 }
 0x4a5   :  { %v3048_v62 = vpop.eup %3047 }
 0x4a9   :  { %v3050_v0 = vpop.eup %3049 }
 0x4ab   :  { %v3052_v2 = vpop.eup %3051 }
 0x4ac   :  { %v3054_v4 = vpop.eup %3053 }
 0x4e7   :  { %v2697_v63 = vpop.f32.mrb[8].mxu1 }
 0x4e8   :  { %v715_v1 = vpop.f32.mrb[9].mxu1  ;;  %v736_v5 = vmul.f32 %v3050_v0, %v2697_v63 }
 0x4e9   :  { %v2698_v3 = vpop.f32.mrb[10].mxu1  ;;  %v734_v8 = vmul.f32 %v3048_v62, %v715_v1 }
 0x4ea   :  { %v737_v6 = vmul.f32 %v3052_v2, %v2698_v3  ;;  %v718_v7 = vpop.f32.mrb[11].mxu1 }
 0x4eb   :  { %v735_v9 = vmul.f32 %v3054_v4, %v718_v7 }
 0x4ec   :  { %v739_v10 = vpack.c.bf16 %v737_v6, %v736_v5 }
 0x4ed   :  { %v738_v11 = vpack.c.bf16 %v735_v9, %v734_v8  ;;  %v2360_v9 = vld [vmem:[%s3762_s2 + $0x47] ss:$0 sm:$0xff] }
 0x4ef   :  { %2715 = vmatprep.mubr.bf16.mxu1 %v738_v11 }
 0x4f0   :  { %2716 = vmatmul.mubr.bf16.vlgmr.msra.gmra.mrb[12].mxu1 %v739_v10 }
 0x4f1   :  { %2740 = vmatpush3.bf16.msra.mxu1 %v2967_v37  ;;  %v2362_v37 = vld [vmem:[%s3762_s2 + $0x49] ss:$0 sm:$0xff] }
 0x4f2   :  { %2741 = vmatprep.subr.bf16.mxu1 %v2968_v38 }
 0x4f5   :  { %2742 = vmatpush3.bf16.msra.mxu1 %v2968_v38 }
 0x4f6   :  { %2743 = vmatprep.subr.bf16.mxu1 %v2969_v39 }
 0x4f9   :  { %2744 = vmatpush3.bf16.msra.mxu1 %v2969_v39 }
 0x4fa   :  { %2745 = vmatprep.subr.bf16.mxu1 %v2970_v40 }
 0x4fd   :  { %2746 = vmatpush3.bf16.msra.mxu1 %v2970_v40 }
 0x4fe   :  { %2747 = vmatprep.subr.bf16.mxu1 %v2971_v41 }
 0x501   :  { %2748 = vmatpush3.bf16.msra.mxu1 %v2971_v41 }
 0x502   :  { %2749 = vmatprep.subr.bf16.mxu1 %v2972_v42 }
 0x505   :  { %2750 = vmatpush3.bf16.msra.mxu1 %v2972_v42 }
 0x506   :  { %2751 = vmatprep.subr.bf16.mxu1 %v2973_v35 }
 0x509   :  { %2752 = vmatpush3.bf16.msra.mxu1 %v2973_v35 }
 0x50a   :  { %2753 = vmatprep.subr.bf16.mxu1 %v2974_v36 }
 0x50d   :  { %2754 = vmatpush3.bf16.msra.mxu1 %v2974_v36 }
 0x5c3   :  { %v2717_v15 = vpop.f32.mrb[12].mxu1 }
 0x5c4   :  { %v852_v16 = vadd.f32 %v2717_v15, %v2351_v13  ;;  %v843_v19 = vpop.f32.mrb[13].mxu1 }
 0x5c5   :  { %v2718_v20 = vpop.f32.mrb[14].mxu1  ;;  %v844_v22 = vadd.f32 %v2351_v13, %v843_v19 }
 0x5c6   :  { %v3319_v21 = vadd.f32 %v852_v16, %v3154_v12  ;;  %v855_v23 = vadd.f32 %v2718_v20, %v2351_v13  ;;  %v846_v24 = vpop.f32.mrb[15].mxu1 }
 0x5c7   :  { %v847_v26 = vadd.f32 %v2351_v13, %v846_v24  ;;  %v3326_v27 = vadd.f32 %v844_v22, %v3156_v14  ;;  %v2361_v22 = vld [vmem:[%s3762_s2 + $0x48] ss:$0 sm:$0xff] }
 0x5c8   :  { %v3322_v25 = vadd.f32 %v855_v23, %v3160_v17  ;;  %866 = vadd.xlane.f32.xlu0 %v3319_v21  ;;  %v876_v14 = vmul.f32 %v3319_v21, %v3319_v21 }
 0x5c9   :  { %v3330_v28 = vadd.f32 %v847_v26, %v3162_v18  ;;  %v874_v12 = vmul.f32 %v3326_v27, %v3326_v27 }
 0x5ca   :  { %868 = vadd.xlane.f32.xlu1 %v3322_v25  ;;  %v877_v18 = vmul.f32 %v3322_v25, %v3322_v25 }
 0x5cb   :  { %v875_v17 = vmul.f32 %v3330_v28, %v3330_v28 }
 0x5cc   :  { %862 = vadd.xlane.f32.xlu0 %v3326_v27 }
 0x5ce   :  { %864 = vadd.xlane.f32.xlu1 %v3330_v28 }
 0x5d0   :  { %878 = vadd.xlane.f32.xlu0 %v874_v12 }
 0x5d2   :  { %880 = vadd.xlane.f32.xlu1 %v875_v17 }
 0x5d4   :  { %882 = vadd.xlane.f32.xlu0 %v876_v14 }
 0x5d6   :  { %884 = vadd.xlane.f32.xlu1 %v877_v18 }
 0x655   :  { %v867_v43 = vpop.xlane.xlu0 %866 }
 0x656   :  { %v872_v50 = vmul.f32 0.03125, %v867_v43 }
 0x657   :  { %v869_v44 = vpop.xlane.xlu1 %868 }
 0x658   :  { %v873_v53 = vmul.f32 0.03125, %v869_v44  ;;  %v892_v59 = vmul.f32 %v872_v50, %v872_v50  ;;  %v908_v15 = vsub.f32 %v3319_v21, %v872_v50 }
 0x659   :  { %v863_v45 = vpop.xlane.xlu0 %862 }
 0x65a   :  { %v870_v46 = vmul.f32 0.03125, %v863_v45  ;;  %v893_v63 = vmul.f32 %v873_v53, %v873_v53  ;;  %v909_v23 = vsub.f32 %v3322_v25, %v873_v53 }
 0x65b   :  { %v865_v47 = vpop.xlane.xlu1 %864 }
 0x65c   :  { %v871_v48 = vmul.f32 0.03125, %v865_v47  ;;  %v890_v51 = vmul.f32 %v870_v46, %v870_v46  ;;  %v906_v7 = vsub.f32 %v3326_v27, %v870_v46 }
 0x65d   :  { %v879_v49 = vpop.xlane.xlu0 %878 }
 0x65e   :  { %v886_v52 = vmul.f32 0.03125, %v879_v49  ;;  %v891_v55 = vmul.f32 %v871_v48, %v871_v48  ;;  %v907_v10 = vsub.f32 %v3330_v28, %v871_v48 }
 0x65f   :  { %v881_v54 = vpop.xlane.xlu1 %880 }
 0x660   :  { %v894_v56 = vsub.f32 %v886_v52, %v890_v51  ;;  %v887_v57 = vmul.f32 0.03125, %v881_v54  ;;  %v2371_v52 = vld [vmem:[%s3762_s2 + $0x4a] ss:$0 sm:$0xff] }
 0x661   :  { %v883_v58 = vpop.xlane.xlu0 %882 }
 0x662   :  { %v898_v60 = vadd.f32 1e-05, %v894_v56  ;;  %v895_v61 = vsub.f32 %v887_v57, %v891_v55  ;;  %v888_v62 = vmul.f32 0.03125, %v883_v58 }
 0x663   :  { %v885_v0 = vpop.xlane.xlu1 %884 }
 0x664   :  { %3055 = vrsqrt.f32 %v898_v60  ;;  %v899_v1 = vadd.f32 1e-05, %v895_v61  ;;  %v896_v2 = vsub.f32 %v888_v62, %v892_v59  ;;  %v889_v3 = vmul.f32 0.03125, %v885_v0 }
 0x666   :  { %3057 = vrsqrt.f32 %v899_v1  ;;  %v900_v4 = vadd.f32 1e-05, %v896_v2  ;;  %v897_v5 = vsub.f32 %v889_v3, %v893_v63  ;;  %v3433_v1 = vld [vmem:[%s3762_s2] sm:$0xff]  ;;  %v3438_v2 = vld [vmem:[%s3762_s2 + $0x8] sm:$0xff] }
 0x667   :  { %v1258_v3 = vmul.f32 %v3433_v1, %v3433_v1 }
 0x668   :  { %3059 = vrsqrt.f32 %v900_v4  ;;  %v901_v6 = vadd.f32 1e-05, %v897_v5  ;;  %v1259_v4 = vmul.f32 %v3438_v2, %v3438_v2  ;;  %v2975_v5 = vld [vmem:[%s3760_s1 + $0x200] sm:$0xff]  }
 0x669   :  { %2779 = vmatprep.subr.bf16.mxu1 %v2975_v5 }
 0x66a   :  { %3061 = vrsqrt.f32 %v901_v6  ;;  %v2976_v6 = vld [vmem:[%s3760_s1 + $0x208] sm:$0xff]  }
 0x66e   :  { %v3056_v8 = vpop.eup %3055 }
 0x66f   :  { %v910_v11 = vmul.f32 %v3056_v8, %v906_v7  ;;  %v2977_v7 = vld [vmem:[%s3760_s1 + $0x1c0] sm:$0xff]   ;;  %v2978_v8 = vld [vmem:[%s3760_s1 + $0x210] sm:$0xff]  }
 0x670   :  { %v3058_v13 = vpop.eup %3057 }
 0x671   :  { %v911_v16 = vmul.f32 %v3058_v13, %v907_v10  ;;  %v919_v19 = vmul.f32 %v2360_v9, %v910_v11  ;;  %v2979_v10 = vld [vmem:[%s3760_s1 + $0x1c8] sm:$0xff]   ;;  %v2980_v11 = vld [vmem:[%s3760_s1 + $0x218] sm:$0xff]   ;;  %v2981_v13 = vld [vmem:[%s3760_s1 + $0x1d0] sm:$0xff]  }
 0x672   :  { %v3060_v20 = vpop.eup %3059 }
 0x673   :  { %v920_v24 = vmul.f32 %v2360_v9, %v911_v16  ;;  %v912_v26 = vmul.f32 %v3060_v20, %v908_v15  ;;  %v928_v17 = vadd.f32 %v2361_v22, %v919_v19  ;;  %v2982_v15 = vld [vmem:[%s3760_s1 + $0x220] sm:$0xff]   ;;  %v2983_v16 = vld [vmem:[%s3760_s1 + $0x1d8] sm:$0xff]   ;;  %v2984_v19 = vld [vmem:[%s3760_s1 + $0x228] sm:$0xff]  }
 0x674   :  { %v3062_v12 = vpop.eup %3061  ;;  %v2985_v20 = vld [vmem:[%s3760_s1 + $0x1e0] sm:$0xff]  }
 0x675   :  { %v929_v14 = vadd.f32 %v2361_v22, %v920_v24  ;;  %v913_v18 = vmul.f32 %v3062_v12, %v909_v23  ;;  %v921_v29 = vmul.f32 %v2360_v9, %v912_v26  ;;  %v2988_v23 = vld [vmem:[%s3760_s1 + $0x238] sm:$0xff]   ;;  %v2987_v24 = vld [vmem:[%s3760_s1 + $0x1e8] sm:$0xff]   ;;  %v2989_v26 = vld [vmem:[%s3760_s1 + $0x1f0] sm:$0xff]  }
 0x676   :  { %v2990_v12 = vld [vmem:[%s3760_s1 + $0x1f8] sm:$0xff]  }
 0x677   :  { %v932_v30 = vpack.c.bf16 %v929_v14, %v928_v17  ;;  %v922_v31 = vmul.f32 %v2360_v9, %v913_v18  ;;  %v930_v32 = vadd.f32 %v2361_v22, %v921_v29  ;;  %v3099_v9 = vmov 0.0   ;;  %v3508_v17 = vld [vmem:[%s3760_s1 + $0x240] sm:$0xff]  }
 0x678   :  { %2759 = vmatprep.subr.bf16.mxu0 %v3099_v9 }
 0x679   :  { %2735 = vmatprep.mubr.bf16.mxu0 %v932_v30  ;;  %v931_v33 = vadd.f32 %v2361_v22, %v922_v31  ;;  %v2986_v22 = vld [vmem:[%s3760_s1 + $0x230] sm:$0xff]  }
 0x67b   :  { %v933_v34 = vpack.c.bf16 %v931_v33, %v930_v32 }
 0x67d   :  { %2736 = vmatmul.mubr.bf16.vlgmr.msra.gmra.mrb[12].mxu0 %v933_v34 }
 0x67e   :  { %2760 = vmatpush3.bf16.msra.mxu0 %v2977_v7  ;;  %2775 = vmatprep.mubr.msk.bf16.mxu0 %vm3100_vm1, %v3099_v9 }
 0x67f   :  { %2761 = vmatprep.subr.bf16.mxu0 %v3099_v9 }
 0x682   :  { %2762 = vmatpush3.bf16.msra.mxu0 %v2979_v10 }
 0x683   :  { %2763 = vmatprep.subr.bf16.mxu0 %v3099_v9 }
 0x686   :  { %2764 = vmatpush3.bf16.msra.mxu0 %v2981_v13 }
 0x687   :  { %2765 = vmatprep.subr.bf16.mxu0 %v3099_v9 }
 0x68a   :  { %2766 = vmatpush3.bf16.msra.mxu0 %v2983_v16 }
 0x68b   :  { %2767 = vmatprep.subr.bf16.mxu0 %v3099_v9 }
 0x68e   :  { %2768 = vmatpush3.bf16.msra.mxu0 %v2985_v20 }
 0x68f   :  { %2769 = vmatprep.subr.bf16.mxu0 %v3099_v9 }
 0x692   :  { %2770 = vmatpush3.bf16.msra.mxu0 %v2987_v24 }
 0x693   :  { %2771 = vmatprep.subr.bf16.mxu0 %v3099_v9 }
 0x696   :  { %2772 = vmatpush3.bf16.msra.mxu0 %v2989_v26 }
 0x697   :  { %2773 = vmatprep.subr.bf16.mxu0 %v3099_v9 }
 0x69a   :  { %2774 = vmatpush3.bf16.msra.mxu0 %v2990_v12 }
 0x69b   :  { %2799 = vmatprep.subr.bf16.mxu0 %v3508_v17 }
 0x750   :  { %v2737_v38 = vpop.f32.mrb[12].mxu0 }
 0x751   :  { %v1046_v39 = vadd.f32 %v2737_v38, %v2362_v37  ;;  %v1037_v40 = vpop.f32.mrb[13].mxu0 }
 0x752   :  { %v1038_v41 = vadd.f32 %v2362_v37, %v1037_v40  ;;  %v2738_v42 = vpop.f32.mrb[14].mxu0 }
 0x753   :  { %v1049_v43 = vadd.f32 %v2738_v42, %v2362_v37  ;;  %v1040_v44 = vpop.f32.mrb[15].mxu0  ;;  %v1054_v46 = vmax.f32 %v1046_v39, 0.0 }
 0x754   :  { %v1041_v45 = vadd.f32 %v2362_v37, %v1040_v44  ;;  %v1052_v48 = vmax.f32 %v1038_v41, 0.0 }
 0x755   :  { %v1055_v47 = vmax.f32 %v1049_v43, 0.0 }
 0x756   :  { %v1053_v49 = vmax.f32 %v1041_v45, 0.0 }
 0x757   :  { %v1057_v50 = vpack.c.bf16 %v1055_v47, %v1054_v46 }
 0x758   :  { %v1056_v51 = vpack.c.bf16 %v1053_v49, %v1052_v48 }
 0x75a   :  { %2755 = vmatprep.mubr.bf16.mxu1 %v1056_v51 }
 0x75b   :  { %2756 = vmatmul.mubr.bf16.vlgmr.msra.gmra.mrb[16].mxu1 %v1057_v50 }
 0x75c   :  { %2780 = vmatpush3.bf16.msra.mxu1 %v2975_v5 }
 0x75d   :  { %2781 = vmatprep.subr.bf16.mxu1 %v2976_v6 }
 0x760   :  { %2782 = vmatpush3.bf16.msra.mxu1 %v2976_v6 }
 0x761   :  { %2783 = vmatprep.subr.bf16.mxu1 %v2978_v8 }
 0x764   :  { %2784 = vmatpush3.bf16.msra.mxu1 %v2978_v8  ;;  %v2380_v8 = vld [vmem:[%s3762_s2 + $0x4b] ss:$0 sm:$0xff] }
 0x765   :  { %2785 = vmatprep.subr.bf16.mxu1 %v2980_v11 }
 0x768   :  { %2786 = vmatpush3.bf16.msra.mxu1 %v2980_v11 }
 0x769   :  { %2787 = vmatprep.subr.bf16.mxu1 %v2982_v15 }
 0x76c   :  { %2788 = vmatpush3.bf16.msra.mxu1 %v2982_v15 }
 0x76d   :  { %2789 = vmatprep.subr.bf16.mxu1 %v2984_v19 }
 0x770   :  { %2790 = vmatpush3.bf16.msra.mxu1 %v2984_v19 }
 0x771   :  { %2791 = vmatprep.subr.bf16.mxu1 %v2986_v22 }
 0x774   :  { %2792 = vmatpush3.bf16.msra.mxu1 %v2986_v22 }
 0x775   :  { %2793 = vmatprep.subr.bf16.mxu1 %v2988_v23 }
 0x778   :  { %2794 = vmatpush3.bf16.msra.mxu1 %v2988_v23 }
 0x779   :  { %2819 = vmatprep.subr.bf16.mxu1 %v3099_v9 }
 0x82e   :  { %v2757_v53 = vpop.f32.mrb[16].mxu1 }
 0x82f   :  { %v1170_v54 = vadd.f32 %v2757_v53, %v2371_v52  ;;  %v1161_v55 = vpop.f32.mrb[17].mxu1 }
 0x830   :  { %v2758_v56 = vpop.f32.mrb[18].mxu1  ;;  %v1162_v58 = vadd.f32 %v2371_v52, %v1161_v55 }
 0x831   :  { %v3407_v57 = vadd.f32 %v1170_v54, %v3319_v21  ;;  %v1173_v59 = vadd.f32 %v2758_v56, %v2371_v52  ;;  %v1164_v60 = vpop.f32.mrb[19].mxu1 }
 0x832   :  { %v1165_v62 = vadd.f32 %v2371_v52, %v1164_v60  ;;  %v3414_v63 = vadd.f32 %v1162_v58, %v3326_v27 }
 0x833   :  { %v3410_v61 = vadd.f32 %v1173_v59, %v3322_v25  ;;  %1184 = vadd.xlane.f32.xlu0 %v3407_v57  ;;  %v1194_v27 = vmul.f32 %v3407_v57, %v3407_v57 }
 0x834   :  { %v3418_v0 = vadd.f32 %v1165_v62, %v3330_v28  ;;  %v1192_v21 = vmul.f32 %v3414_v63, %v3414_v63 }
 0x835   :  { %1186 = vadd.xlane.f32.xlu1 %v3410_v61  ;;  %v1195_v28 = vmul.f32 %v3410_v61, %v3410_v61 }
 0x836   :  { %v1193_v25 = vmul.f32 %v3418_v0, %v3418_v0 }
 0x837   :  { %1180 = vadd.xlane.f32.xlu0 %v3414_v63 }
 0x839   :  { %1182 = vadd.xlane.f32.xlu1 %v3418_v0 }
 0x83b   :  { %1196 = vadd.xlane.f32.xlu0 %v1192_v21 }
 0x83d   :  { %1198 = vadd.xlane.f32.xlu1 %v1193_v25 }
 0x83f   :  { %1200 = vadd.xlane.f32.xlu0 %v1194_v27 }
 0x841   :  { %1202 = vadd.xlane.f32.xlu1 %v1195_v28 }
 0x843   :  { %1252 = vadd.xlane.f32.xlu0 %v3433_v1 }
 0x845   :  { %1254 = vadd.xlane.f32.xlu1 %v3438_v2 }
 0x847   :  { %1260 = vadd.xlane.f32.xlu0 %v1258_v3 }
 0x849   :  { %1262 = vadd.xlane.f32.xlu1 %v1259_v4 }
 0x8c0   :  { %v1185_v14 = vpop.xlane.xlu0 %1184 }
 0x8c1   :  { %v1190_v34 = vmul.f32 0.03125, %v1185_v14 }
 0x8c2   :  { %v1187_v18 = vpop.xlane.xlu1 %1186 }
 0x8c3   :  { %v1191_v37 = vmul.f32 0.03125, %v1187_v18  ;;  %v1210_v43 = vmul.f32 %v1190_v34, %v1190_v34  ;;  %v1226_v16 = vsub.f32 %v3407_v57, %v1190_v34 }
 0x8c4   :  { %v1181_v29 = vpop.xlane.xlu0 %1180 }
 0x8c5   :  { %v1188_v30 = vmul.f32 0.03125, %v1181_v29  ;;  %v1211_v47 = vmul.f32 %v1191_v37, %v1191_v37  ;;  %v1227_v23 = vsub.f32 %v3410_v61, %v1191_v37 }
 0x8c6   :  { %v1183_v31 = vpop.xlane.xlu1 %1182 }
 0x8c7   :  { %v1189_v32 = vmul.f32 0.03125, %v1183_v31  ;;  %v1208_v35 = vmul.f32 %v1188_v30, %v1188_v30  ;;  %v1224_v4 = vsub.f32 %v3414_v63, %v1188_v30  ;;  %v2381_v63 = vld [vmem:[%s3762_s2 + $0x4c] ss:$0 sm:$0xff] }
 0x8c8   :  { %v1197_v33 = vpop.xlane.xlu0 %1196 }
 0x8c9   :  { %v1204_v36 = vmul.f32 0.03125, %v1197_v33  ;;  %v1209_v39 = vmul.f32 %v1189_v32, %v1189_v32  ;;  %v1225_v10 = vsub.f32 %v3418_v0, %v1189_v32 }
 0x8ca   :  { %v1199_v38 = vpop.xlane.xlu1 %1198 }
 0x8cb   :  { %v1212_v40 = vsub.f32 %v1204_v36, %v1208_v35  ;;  %v1205_v41 = vmul.f32 0.03125, %v1199_v38  ;;  %v2382_v35 = vld [vmem:[%s3762_s2 + $0x4d] ss:$0 sm:$0xff] }
 0x8cc   :  { %v1201_v42 = vpop.xlane.xlu0 %1200 }
 0x8cd   :  { %v1216_v44 = vadd.f32 1e-05, %v1212_v40  ;;  %v1213_v45 = vsub.f32 %v1205_v41, %v1209_v39  ;;  %v1206_v46 = vmul.f32 0.03125, %v1201_v42  ;;  %v2383_v41 = vld [vmem:[%s3762_s2 + $0x4e] ss:$0 sm:$0xff] }
 0x8ce   :  { %v1203_v48 = vpop.xlane.xlu1 %1202 }
 0x8cf   :  { %3063 = vrsqrt.f32 %v1216_v44  ;;  %v1217_v49 = vadd.f32 1e-05, %v1213_v45  ;;  %v1214_v50 = vsub.f32 %v1206_v46, %v1210_v43  ;;  %v1207_v51 = vmul.f32 0.03125, %v1203_v48  ;;  %v2992_v46 = vld [vmem:[%s3760_s1 + $0x248] sm:$0xff]   ;;  %v2994_v48 = vld [vmem:[%s3760_s1 + $0x258] sm:$0xff]  }
 0x8d0   :  { %v1253_v52 = vpop.xlane.xlu0 %1252 }
 0x8d1   :  { %3065 = vrsqrt.f32 %v1217_v49  ;;  %v1218_v53 = vadd.f32 1e-05, %v1214_v50  ;;  %v1215_v54 = vsub.f32 %v1207_v51, %v1211_v47  ;;  %v1256_v55 = vmul.f32 0.03125, %v1253_v52  ;;  %v2993_v47 = vld [vmem:[%s3760_s1 + $0x250] sm:$0xff]   ;;  %v2995_v49 = vld [vmem:[%s3760_s1 + $0x260] sm:$0xff]   ;;  %v2998_v51 = vld [vmem:[%s3760_s1 + $0x278] sm:$0xff]  }
 0x8d2   :  { %v1255_v56 = vpop.xlane.xlu1 %1254  ;;  %v2997_v50 = vld [vmem:[%s3760_s1 + $0x270] sm:$0xff]  }
 0x8d3   :  { %3067 = vrsqrt.f32 %v1218_v53  ;;  %v1219_v58 = vadd.f32 1e-05, %v1215_v54  ;;  %v1266_v59 = vmul.f32 %v1256_v55, %v1256_v55  ;;  %v1257_v60 = vmul.f32 0.03125, %v1255_v56  ;;  %v2393_v53 = vld [vmem:[%s3762_s2 + $0x50] ss:$0 sm:$0xff] }
 0x8d4   :  { %v1261_v62 = vpop.xlane.xlu0 %1260  ;;  %v1274_v57 = vsub.f32 %v3433_v1, %v1256_v55 }
 0x8d5   :  { %3069 = vrsqrt.f32 %v1219_v58  ;;  %v1264_v21 = vmul.f32 0.03125, %v1261_v62  ;;  %v1267_v25 = vmul.f32 %v1257_v60, %v1257_v60  ;;  %v1275_v61 = vsub.f32 %v3438_v2, %v1257_v60 }
 0x8d6   :  { %v1263_v27 = vpop.xlane.xlu1 %1262 }
 0x8d7   :  { %v1268_v28 = vsub.f32 %v1264_v21, %v1266_v59  ;;  %v1265_v3 = vmul.f32 0.03125, %v1263_v27  ;;  %v2384_v27 = vld [vmem:[%s3762_s2 + $0x4f] ss:$0 sm:$0xff] }
 0x8d9   :  { %v3064_v5 = vpop.eup %3063  ;;  %v1270_v6 = vadd.f32 1e-05, %v1268_v28  ;;  %v1269_v7 = vsub.f32 %v1265_v3, %v1267_v25 }
 0x8da   :  { %v1228_v11 = vmul.f32 %v3064_v5, %v1224_v4 }
 0x8db   :  { %v3066_v13 = vpop.eup %3065  ;;  %3071 = vrsqrt.f32 %v1270_v6  ;;  %v1271_v15 = vadd.f32 1e-05, %v1269_v7 }
 0x8dc   :  { %v1229_v19 = vmul.f32 %v3066_v13, %v1225_v10  ;;  %v1237_v20 = vmul.f32 %v2380_v8, %v1228_v11  ;;  %v2402_v11 = vld [vmem:[%s3762_s2 + $0x51] ss:$0 sm:$0xff] }
 0x8dd   :  { %v3068_v22 = vpop.eup %3067  ;;  %3073 = vrsqrt.f32 %v1271_v15 }
 0x8de   :  { %v1238_v24 = vmul.f32 %v2380_v8, %v1229_v19  ;;  %v1230_v26 = vmul.f32 %v3068_v22, %v1226_v16  ;;  %v1246_v0 = vadd.f32 %v2381_v63, %v1237_v20 }
 0x8df   :  { %v3070_v12 = vpop.eup %3069 }
 0x8e0   :  { %v1247_v14 = vadd.f32 %v2381_v63, %v1238_v24  ;;  %v1231_v18 = vmul.f32 %v3070_v12, %v1227_v23  ;;  %v1239_v29 = vmul.f32 %v2380_v8, %v1230_v26  ;;  %v19_v26 = vld [vmem:[%s3762_s2 + $0x30] sm:$0xff] }
 0x8e2   :  { %v1403_v30 = vpack.c.bf16 %v1247_v14, %v1246_v0  ;;  %v1240_v31 = vmul.f32 %v2380_v8, %v1231_v18  ;;  %v1248_v32 = vadd.f32 %v2381_v63, %v1239_v29  ;;  %v20_v0 = vld [vmem:[%s3762_s2 + $0x38] sm:$0xff] }
 0x8e4   :  { %2795 = vmatprep.mubr.bf16.mxu1 %v1403_v30  ;;  %v1249_v33 = vadd.f32 %v2381_v63, %v1240_v31 }
 0x8e5   :  { %v3072_v34 = vpop.eup %3071 }
 0x8e6   :  { %v1404_v36 = vpack.c.bf16 %v1249_v33, %v1248_v32  ;;  %v1276_v37 = vmul.f32 %v3072_v34, %v1274_v57 }
 0x8e7   :  { %v3074_v38 = vpop.eup %3073 }
 0x8e8   :  { %2796 = vmatmul.mubr.bf16.vlgmr.msra.gmra.mrb[20].mxu1 %v1404_v36  ;;  %v1277_v39 = vmul.f32 %v3074_v38, %v1275_v61  ;;  %v1283_v40 = vmul.f32 %v2382_v35, %v1276_v37 }
 0x8e9   :  { %2823 = vmatprep.mubr.msk.bf16.mxu1 %vm3100_vm1, %v3099_v9 }
 0x8ea   :  { %v1284_v42 = vmul.f32 %v2382_v35, %v1277_v39  ;;  %v1290_v43 = vadd.f32 %v2383_v41, %v1283_v40 }
 0x8ec   :  { %v1291_v44 = vadd.f32 %v2383_v41, %v1284_v42 }
 0x8ee   :  { %v1292_v45 = vpack.c.bf16 %v1291_v44, %v1290_v43  ;;  %v2999_v43 = vld [vmem:[%s3760_s1 + $0x280] sm:$0xff]   ;;  %v3000_v44 = vld [vmem:[%s3760_s1 + $0x288] sm:$0xff]  }
 0x8f0   :  { %2776 = vmatmul.mubr.bf16.vlgmr.msra.gmra.mrb[16].mxu0 %v1292_v45  ;;  %v3001_v45 = vld [vmem:[%s3760_s1 + $0x290] sm:$0xff]  }
 0x8f1   :  { %2800 = vmatpush3.bf16.msra.mxu0 %v3508_v17  ;;  %2815 = vmatprep.mubr.bf16.mxu0 %v1403_v30  ;;  %v2996_v17 = vld [vmem:[%s3760_s1 + $0x268] sm:$0xff]  }
 0x8f2   :  { %2801 = vmatprep.subr.bf16.mxu0 %v2992_v46 }
 0x8f5   :  { %2802 = vmatpush3.bf16.msra.mxu0 %v2992_v46  ;;  %v3002_v46 = vld [vmem:[%s3760_s1 + $0x298] sm:$0xff]  }
 0x8f6   :  { %2803 = vmatprep.subr.bf16.mxu0 %v2993_v47 }
 0x8f9   :  { %2804 = vmatpush3.bf16.msra.mxu0 %v2993_v47  ;;  %v3003_v47 = vld [vmem:[%s3760_s1 + $0x2a0] sm:$0xff]  }
 0x8fa   :  { %2805 = vmatprep.subr.bf16.mxu0 %v2994_v48 }
 0x8fd   :  { %2806 = vmatpush3.bf16.msra.mxu0 %v2994_v48  ;;  %v3004_v48 = vld [vmem:[%s3760_s1 + $0x2a8] sm:$0xff]  }
 0x8fe   :  { %2807 = vmatprep.subr.bf16.mxu0 %v2995_v49 }
 0x901   :  { %2808 = vmatpush3.bf16.msra.mxu0 %v2995_v49  ;;  %v3005_v49 = vld [vmem:[%s3760_s1 + $0x2b0] sm:$0xff]  }
 0x902   :  { %2809 = vmatprep.subr.bf16.mxu0 %v2996_v17 }
 0x905   :  { %2810 = vmatpush3.bf16.msra.mxu0 %v2996_v17  ;;  %v3006_v17 = vld [vmem:[%s3760_s1 + $0x2b8] sm:$0xff]  }
 0x906   :  { %2811 = vmatprep.subr.bf16.mxu0 %v2997_v50 }
 0x909   :  { %2812 = vmatpush3.bf16.msra.mxu0 %v2997_v50 }
 0x90a   :  { %2813 = vmatprep.subr.bf16.mxu0 %v2998_v51 }
 0x90d   :  { %2814 = vmatpush3.bf16.msra.mxu0 %v2998_v51 }
 0x90e   :  { %2827 = vmatprep.subr.bf16.mxu0 %v3099_v9 }
 0x910   :  { %2816 = vmatmul.mubr.bf16.vlgmr.msra.gmra.mrb[20].mxu0 %v1404_v36 }
 0x911   :  { %2831 = vmatprep.mubr.msk.bf16.mxu0 %vm3100_vm1, %v3099_v9 }
 0x9bb   :  { %v2797_v52 = vpop.f32.mrb[20].mxu1 }
 0x9bc   :  { %v1508_v54 = vpop.f32.mrb[21].mxu1  ;;  %v1517_v56 = vadd.f32 %v2797_v52, %v2393_v53 }
 0x9bd   :  { %v2798_v55 = vpop.f32.mrb[22].mxu1  ;;  %v1509_v60 = vadd.f32 %v2393_v53, %v1508_v54 }
 0x9be   :  { %v1520_v58 = vadd.f32 %v2798_v55, %v2393_v53  ;;  %v1511_v59 = vpop.f32.mrb[23].mxu1 }
 0x9bf   :  { %v1512_v62 = vadd.f32 %v2393_v53, %v1511_v59 }
 0x9c0   :  { %v1643_v21 = vpack.c.bf16 %v1520_v58, %v1517_v56 }
 0x9c1   :  { %v1642_v25 = vpack.c.bf16 %v1512_v62, %v1509_v60 }
 0x9c3   :  { %v1396_v28 = vpop.f32.mrb[16].mxu0  ;;  %2820 = vmatpush3.bf16.xpose.msra.mxu1 %v1642_v25 }
 0x9c4   :  { %v2777_v3 = vpop.f32.mrb[17].mxu0  ;;  %2821 = vmatprep.subr.bf16.mxu1 %v3099_v9  ;;  %v1397_v5 = vadd.f32 %v2384_v27, %v1396_v28 }
 0x9c5   :  { %v1399_v4 = vpop.f32.mrb[18].mxu0 }
 0x9c6   :  { %v1400_v6 = vadd.f32 %v2384_v27, %v1399_v4  ;;  %v2778_v7 = vpop.f32.mrb[19].mxu0 }
 0x9c8   :  { %v1641_v8 = vpack.c.bf16 %v1400_v6, %v1397_v5 }
 0x9cb   :  { %2822 = vmatpush3.bf16.xpose.msra.mxu1 %v1643_v21  ;;  %v2412_v21 = vld [vmem:[%s3762_s2 + $0x52] ss:$0 sm:$0xff] }
 0x9cc   :  { %2855 = vmatprep.subr.bf16.mxu1 %v3099_v9 }
 0x9d2   :  { %2824 = vmatmul.mubr.bf16.vlgmr.msra.gmra.mrb[24].mxu1 %v1641_v8 }
 0x9d3   :  { %2871 = vmatprep.mubr.msk.bf16.mxu1 %vm3100_vm1, %v3099_v9 }
 0x9e3   :  { %v2817_v10 = vpop.f32.mrb[20].mxu0 }
 0x9e4   :  { %v1626_v13 = vpop.f32.mrb[21].mxu0  ;;  %v1635_v16 = vadd.f32 %v2817_v10, %v2402_v11 }
 0x9e5   :  { %v2818_v15 = vpop.f32.mrb[22].mxu0  ;;  %v1627_v22 = vadd.f32 %v2402_v11, %v1626_v13  ;;  %v3010_v13 = vld [vmem:[%s3760_s1 + $0x2d8] sm:$0xff]  }
 0x9e6   :  { %v1638_v19 = vadd.f32 %v2818_v15, %v2402_v11  ;;  %v1629_v20 = vpop.f32.mrb[23].mxu0  ;;  %v3011_v15 = vld [vmem:[%s3760_s1 + $0x2e0] sm:$0xff]  }
 0x9e7   :  { %v1630_v63 = vadd.f32 %v2402_v11, %v1629_v20  ;;  %v3009_v11 = vld [vmem:[%s3760_s1 + $0x2d0] sm:$0xff]   ;;  %v3014_v20 = vld [vmem:[%s3760_s1 + $0x2f8] sm:$0xff]  }
 0x9e8   :  { %v1705_v23 = vpack.c.bf16 %v1638_v19, %v1635_v16  ;;  %v3012_v16 = vld [vmem:[%s3760_s1 + $0x2e8] sm:$0xff]   ;;  %v3013_v19 = vld [vmem:[%s3760_s1 + $0x2f0] sm:$0xff]  }
 0x9e9   :  { %v1704_v24 = vpack.c.bf16 %v1630_v63, %v1627_v22  ;;  %v3015_v22 = vld [vmem:[%s3760_s1 + $0x300] sm:$0xff]   ;;  %v3016_v63 = vld [vmem:[%s3760_s1 + $0x308] sm:$0xff]  }
 0x9eb   :  { %2828 = vmatpush3.bf16.msra.mxu0 %v1704_v24  ;;  %v3018_v24 = vld [vmem:[%s3760_s1 + $0x318] sm:$0xff]  }
 0x9ec   :  { %2829 = vmatprep.subr.bf16.mxu0 %v3099_v9 }
 0x9ef   :  { %2830 = vmatpush3.bf16.msra.mxu0 %v1705_v23  ;;  %v3017_v23 = vld [vmem:[%s3760_s1 + $0x310] sm:$0xff]  }
 0x9f0   :  { %2835 = vmatprep.subr.bf16.mxu0 %v3099_v9 }
 0xaa5   :  { %v1678_v12 = vpop.f32.mrb[24].mxu1 }
 0xaa6   :  { %v1679_v14 = vadd.f32 %v1678_v12, %v19_v26  ;;  %v2825_v18 = vpop.f32.mrb[25].mxu1  ;;  %v3019_v26 = vld [vmem:[%s3760_s1 + $0x320] sm:$0xff]   ;;  %v3020_v12 = vld [vmem:[%s3760_s1 + $0x328] sm:$0xff]  }
 0xaa7   :  { %v1681_v29 = vpop.f32.mrb[26].mxu1 }
 0xaa8   :  { %v1682_v30 = vadd.f32 %v1681_v29, %v20_v0  ;;  %v2826_v31 = vpop.f32.mrb[27].mxu1  ;;  %v1685_v57 = vsel %vm634_vm0, %v1679_v14, -inf }
 0xaa9   :  { %1686 = vmax.xlane.f32.xlu0 %v1685_v57 }
 0xaaa   :  { %v1688_v32 = vsel %vm634_vm0, %v1682_v30, -inf }
 0xaab   :  { %1689 = vmax.xlane.f32.xlu1 %v1688_v32 }
 0xb36   :  { %v1687_v33 = vpop.xlane.xlu0 %1686 }
 0xb37   :  { %v1691_v34 = vsub.f32 %v1679_v14, %v1687_v33 }
 0xb38   :  { %v1690_v35 = vpop.xlane.xlu1 %1689 }
 0xb39   :  { %v1693_v61 = vmul.f32 1.442695, %v1691_v34  ;;  %v1692_v36 = vsub.f32 %v1682_v30, %v1690_v35 }
 0xb3b   :  { %3075 = vpow2.f32 %v1693_v61  ;;  %v1695_v37 = vmul.f32 1.442695, %v1692_v36 }
 0xb3d   :  { %3077 = vpow2.f32 %v1695_v37 }
 0xb45   :  { %v3076_v38 = vpop.eup %3075 }
 0xb46   :  { %v1697_v39 = vsel %vm634_vm0, %v3076_v38, 0.0 }
 0xb47   :  { %v3078_v40 = vpop.eup %3077  ;;  %1698 = vadd.xlane.f32.xlu0 %v1697_v39 }
 0xb48   :  { %v1700_v41 = vsel %vm634_vm0, %v3078_v40, 0.0  ;;  %v1703_v42 = vpack.c.bf16 %v3078_v40, %v3076_v38  ;;  %v2421_v40 = vld [vmem:[%s3762_s2 + $0x53] ss:$0 sm:$0xff] }
 0xb49   :  { %1701 = vadd.xlane.f32.xlu1 %v1700_v41 }
 0xb4a   :  { %2832 = vmatmul.mubr.msk.bf16.vlgmr.msra.gmra.mrb[24].mxu0 %vm634_vm0, %v1703_v42 }
 0xb4b   :  { %2851 = vmatprep.mubr.msk.bf16.mxu0 %vm3100_vm1, %v3099_v9  ;;  %2836 = vmatpush3.bf16.msra.mxu0 %v2999_v43 }
 0xb4c   :  { %2837 = vmatprep.subr.bf16.mxu0 %v3099_v9 }
 0xb4f   :  { %2838 = vmatpush3.bf16.msra.mxu0 %v3000_v44 }
 0xb50   :  { %2839 = vmatprep.subr.bf16.mxu0 %v3099_v9 }
 0xb53   :  { %2840 = vmatpush3.bf16.msra.mxu0 %v3001_v45 }
 0xb54   :  { %2841 = vmatprep.subr.bf16.mxu0 %v3099_v9 }
 0xb57   :  { %2842 = vmatpush3.bf16.msra.mxu0 %v3002_v46  ;;  %v2422_v46 = vld [vmem:[%s3762_s2 + $0x54] ss:$0 sm:$0xff] }
 0xb58   :  { %2843 = vmatprep.subr.bf16.mxu0 %v3099_v9 }
 0xb5b   :  { %2844 = vmatpush3.bf16.msra.mxu0 %v3003_v47 }
 0xb5c   :  { %2845 = vmatprep.subr.bf16.mxu0 %v3099_v9 }
 0xb5f   :  { %2846 = vmatpush3.bf16.msra.mxu0 %v3004_v48 }
 0xb60   :  { %2847 = vmatprep.subr.bf16.mxu0 %v3099_v9 }
 0xb63   :  { %2848 = vmatpush3.bf16.msra.mxu0 %v3005_v49 }
 0xb64   :  { %2849 = vmatprep.subr.bf16.mxu0 %v3099_v9 }
 0xb67   :  { %2850 = vmatpush3.bf16.msra.mxu0 %v3006_v17 }
 0xb68   :  { %2875 = vmatprep.subr.bf16.mxu0 %v3099_v9 }
 0xbd4   :  { %v1699_v50 = vpop.xlane.xlu0 %1698 }
 0xbd5   :  { %3079 = vrcp.f32 %v1699_v50  ;;  %v3021_v50 = vld [vmem:[%s3760_s1 + $0x330] sm:$0xff]  }
 0xbd6   :  { %v1702_v51 = vpop.xlane.xlu1 %1701 }
 0xbd7   :  { %3081 = vrcp.f32 %v1702_v51  ;;  %v3022_v51 = vld [vmem:[%s3760_s1 + $0x338] sm:$0xff]  }
 0xbdf   :  { %v3080_v53 = vpop.eup %3079 }
 0xbe1   :  { %v3082_v55 = vpop.eup %3081 }
 0xc1d   :  { %v1743_v52 = vpop.f32.mrb[24].mxu0 }
 0xc1e   :  { %v2833_v54 = vpop.f32.mrb[25].mxu0  ;;  %v1752_v58 = vmul.f32 %v3080_v53, %v1743_v52  ;;  %v2423_v52 = vld [vmem:[%s3762_s2 + $0x55] ss:$0 sm:$0xff] }
 0xc1f   :  { %v1746_v56 = vpop.f32.mrb[26].mxu0 }
 0xc20   :  { %v1753_v59 = vmul.f32 %v3082_v55, %v1746_v56  ;;  %v2834_v60 = vpop.f32.mrb[27].mxu0 }
 0xc22   :  { %v1754_v62 = vpack.c.bf16 %v1753_v59, %v1752_v58 }
 0xc24   :  { %2852 = vmatmul.mubr.bf16.vlgmr.msra.gmra.mrb[28].mxu0 %v1754_v62 }
 0xc25   :  { %2891 = vmatprep.mubr.msk.bf16.mxu0 %vm3100_vm1, %v3099_v9  ;;  %2876 = vmatpush3.bf16.msra.mxu0 %v3015_v22  ;;  %v3030_v22 = vld [vmem:[%s3760_s1 + $0x378] sm:$0xff]  }
 0xc26   :  { %2877 = vmatprep.subr.bf16.mxu0 %v3099_v9 }
 0xc29   :  { %2878 = vmatpush3.bf16.msra.mxu0 %v3016_v63 }
 0xc2a   :  { %2879 = vmatprep.subr.bf16.mxu0 %v3099_v9 }
 0xc2d   :  { %2880 = vmatpush3.bf16.msra.mxu0 %v3017_v23 }
 0xc2e   :  { %2881 = vmatprep.subr.bf16.mxu0 %v3099_v9 }
 0xc31   :  { %2882 = vmatpush3.bf16.msra.mxu0 %v3018_v24 }
 0xc32   :  { %2883 = vmatprep.subr.bf16.mxu0 %v3099_v9 }
 0xc35   :  { %2884 = vmatpush3.bf16.msra.mxu0 %v3019_v26 }
 0xc36   :  { %2885 = vmatprep.subr.bf16.mxu0 %v3099_v9 }
 0xc39   :  { %2886 = vmatpush3.bf16.msra.mxu0 %v3020_v12 }
 0xc3a   :  { %2887 = vmatprep.subr.bf16.mxu0 %v3099_v9 }
 0xc3d   :  { %2888 = vmatpush3.bf16.msra.mxu0 %v3021_v50 }
 0xc3e   :  { %2889 = vmatprep.subr.bf16.mxu0 %v3099_v9 }
 0xc41   :  { %2890 = vmatpush3.bf16.msra.mxu0 %v3022_v51 }
 0xcf7   :  { %v1858_v25 = vpop.f32.mrb[28].mxu0 }
 0xcf8   :  { %v1859_v27 = vadd.f32 %v2412_v21, %v1858_v25  ;;  %v2853_v28 = vpop.f32.mrb[29].mxu0  ;;  %v2432_v25 = vld [vmem:[%s3762_s2 + $0x56] ss:$0 sm:$0xff] }
 0xcf9   :  { %v1861_v3 = vpop.f32.mrb[30].mxu0 }
 0xcfa   :  { %v3622_v4 = vadd.f32 %v1859_v27, %v3433_v1  ;;  %v1862_v5 = vadd.f32 %v2412_v21, %v1861_v3  ;;  %v2854_v6 = vpop.f32.mrb[31].mxu0  ;;  %v3007_v1 = vld [vmem:[%s3760_s1 + $0x2c0] sm:$0xff]  }
 0xcfb   :  { %2856 = vmatpush3.bf16.msra.mxu1 %v3007_v1 }
 0xcfc   :  { %v3625_v7 = vadd.f32 %v1862_v5, %v3438_v2  ;;  %1867 = vadd.xlane.f32.xlu0 %v3622_v4  ;;  %v1873_v8 = vmul.f32 %v3622_v4, %v3622_v4  ;;  %2857 = vmatprep.subr.bf16.mxu1 %v3099_v9  ;;  %v3008_v2 = vld [vmem:[%s3760_s1 + $0x2c8] sm:$0xff]  }
 0xcfe   :  { %1869 = vadd.xlane.f32.xlu1 %v3625_v7  ;;  %v1874_v10 = vmul.f32 %v3625_v7, %v3625_v7 }
 0xcff   :  { %2858 = vmatpush3.bf16.msra.mxu1 %v3008_v2 }
 0xd00   :  { %1875 = vadd.xlane.f32.xlu0 %v1873_v8  ;;  %2859 = vmatprep.subr.bf16.mxu1 %v3099_v9 }
 0xd02   :  { %1877 = vadd.xlane.f32.xlu1 %v1874_v10 }
 0xd03   :  { %2860 = vmatpush3.bf16.msra.mxu1 %v3009_v11 }
 0xd04   :  { %2861 = vmatprep.subr.bf16.mxu1 %v3099_v9 }
 0xd07   :  { %2862 = vmatpush3.bf16.msra.mxu1 %v3010_v13  ;;  %v3023_v13 = vld [vmem:[%s3760_s1 + $0x340] sm:$0xff]  }
 0xd08   :  { %2863 = vmatprep.subr.bf16.mxu1 %v3099_v9 }
 0xd0b   :  { %2864 = vmatpush3.bf16.msra.mxu1 %v3011_v15  ;;  %v3026_v15 = vld [vmem:[%s3760_s1 + $0x358] sm:$0xff]  }
 0xd0c   :  { %2865 = vmatprep.subr.bf16.mxu1 %v3099_v9 }
 0xd0f   :  { %2866 = vmatpush3.bf16.msra.mxu1 %v3012_v16  ;;  %v3027_v16 = vld [vmem:[%s3760_s1 + $0x360] sm:$0xff]  }
 0xd10   :  { %2867 = vmatprep.subr.bf16.mxu1 %v3099_v9 }
 0xd13   :  { %2868 = vmatpush3.bf16.msra.mxu1 %v3013_v19  ;;  %v3028_v19 = vld [vmem:[%s3760_s1 + $0x368] sm:$0xff]  }
 0xd14   :  { %2869 = vmatprep.subr.bf16.mxu1 %v3099_v9 }
 0xd17   :  { %2870 = vmatpush3.bf16.msra.mxu1 %v3014_v20  ;;  %v3029_v20 = vld [vmem:[%s3760_s1 + $0x370] sm:$0xff]  }
 0xd18   :  { %2895 = vmatprep.subr.bf16.mxu1 %v3099_v9 }
 0xd89   :  { %v1868_v0 = vpop.xlane.xlu0 %1867 }
 0xd8a   :  { %v1871_v14 = vmul.f32 0.03125, %v1868_v0 }
 0xd8b   :  { %v1870_v18 = vpop.xlane.xlu1 %1869 }
 0xd8c   :  { %v1872_v29 = vmul.f32 0.03125, %v1870_v18  ;;  %v1881_v31 = vmul.f32 %v1871_v14, %v1871_v14  ;;  %v1889_v38 = vsub.f32 %v3622_v4, %v1871_v14 }
 0xd8d   :  { %v1876_v30 = vpop.xlane.xlu0 %1875 }
 0xd8e   :  { %v1879_v57 = vmul.f32 0.03125, %v1876_v30  ;;  %v1882_v33 = vmul.f32 %v1872_v29, %v1872_v29  ;;  %v1890_v41 = vsub.f32 %v3625_v7, %v1872_v29 }
 0xd8f   :  { %v1878_v32 = vpop.xlane.xlu1 %1877 }
 0xd90   :  { %v1883_v34 = vsub.f32 %v1879_v57, %v1881_v31  ;;  %v1880_v35 = vmul.f32 0.03125, %v1878_v32 }
 0xd92   :  { %v1885_v61 = vadd.f32 1e-05, %v1883_v34  ;;  %v1884_v36 = vsub.f32 %v1880_v35, %v1882_v33 }
 0xd94   :  { %3083 = vrsqrt.f32 %v1885_v61  ;;  %v1886_v37 = vadd.f32 1e-05, %v1884_v36 }
 0xd96   :  { %3085 = vrsqrt.f32 %v1886_v37 }
 0xd9e   :  { %v3084_v39 = vpop.eup %3083 }
 0xd9f   :  { %v1891_v42 = vmul.f32 %v3084_v39, %v1889_v38 }
 0xda0   :  { %v3086_v43 = vpop.eup %3085 }
 0xda1   :  { %v1892_v44 = vmul.f32 %v3086_v43, %v1890_v41  ;;  %v1898_v45 = vmul.f32 %v2421_v40, %v1891_v42 }
 0xda3   :  { %v1899_v47 = vmul.f32 %v2421_v40, %v1892_v44  ;;  %v1905_v48 = vadd.f32 %v2422_v46, %v1898_v45  ;;  %v2442_v40 = vld [vmem:[%s3762_s2 + $0x58] ss:$0 sm:$0xff]  ;;  %v2443_v45 = vld [vmem:[%s3762_s2 + $0x59] ss:$0 sm:$0xff] }
 0xda5   :  { %v1906_v49 = vadd.f32 %v2422_v46, %v1899_v47 }
 0xda7   :  { %v1907_v17 = vpack.c.bf16 %v1906_v49, %v1905_v48 }
 0xda9   :  { %2872 = vmatmul.mubr.bf16.vlgmr.msra.gmra.mrb[28].mxu1 %v1907_v17 }
 0xdaa   :  { %2911 = vmatprep.mubr.msk.bf16.mxu1 %vm3100_vm1, %v3099_v9  ;;  %2896 = vmatpush3.bf16.msra.mxu1 %v3023_v13 }
 0xdab   :  { %2897 = vmatprep.subr.bf16.mxu1 %v3099_v9 }
 0xe7c   :  { %v2011_v53 = vpop.f32.mrb[28].mxu1 }
 0xe7d   :  { %v2012_v54 = vadd.f32 %v2423_v52, %v2011_v53  ;;  %v2873_v55 = vpop.f32.mrb[29].mxu1 }
 0xe7e   :  { %v2014_v56 = vpop.f32.mrb[30].mxu1 }
 0xe7f   :  { %v2015_v58 = vadd.f32 %v2423_v52, %v2014_v56  ;;  %v2874_v59 = vpop.f32.mrb[31].mxu1  ;;  %v2018_v60 = vmax.f32 %v2012_v54, 0.0  ;;  %v2284_v54 = vlaneseq }
 0xe81   :  { %v2019_v62 = vmax.f32 %v2015_v58, 0.0  ;;  %v2285_v59 = vand.u32 127, %v2284_v54 }
 0xe83   :  { %v2020_v21 = vpack.c.bf16 %v2019_v62, %v2018_v60  ;;  %vm2286_vm2 = vcmp.ge.s32.totalorder %v2285_v59, 5  ;;  %vm2287_vm3 = vcmp.lt.s32.totalorder %v2285_v59, 9 }
 0xe84   :  { %vm2288_vm4 = vmand %vm2286_vm2, %vm2287_vm3 }
 0xe85   :  { %2892 = vmatmul.mubr.bf16.vlgmr.msra.gmra.mrb[32].mxu0 %v2020_v21 }
 0xf58   :  { %v2124_v27 = vpop.f32.mrb[32].mxu0 }
 0xf59   :  { %v2125_v28 = vadd.f32 %v2432_v25, %v2124_v27  ;;  %v2893_v3 = vpop.f32.mrb[33].mxu0 }
 0xf5a   :  { %v2127_v5 = vpop.f32.mrb[34].mxu0 }
 0xf5b   :  { %v2131_v6 = vadd.f32 %v2125_v28, %v3622_v4  ;;  %v2128_v8 = vadd.f32 %v2432_v25, %v2127_v5  ;;  %v2894_v10 = vpop.f32.mrb[35].mxu0  ;;  %v3024_v4 = vld [vmem:[%s3760_s1 + $0x348] sm:$0xff]  }
 0xf5c   :  { %2898 = vmatpush3.bf16.msra.mxu1 %v3024_v4 }
 0xf5d   :  { %v2132_v1 = vadd.f32 %v2128_v8, %v3625_v7  ;;  %2133 = vadd.xlane.f32.xlu0 %v2131_v6  ;;  %v2139_v2 = vmul.f32 %v2131_v6, %v2131_v6  ;;  %2899 = vmatprep.subr.bf16.mxu1 %v3099_v9  ;;  %v3025_v7 = vld [vmem:[%s3760_s1 + $0x350] sm:$0xff]  }
 0xf5f   :  { %2135 = vadd.xlane.f32.xlu1 %v2132_v1  ;;  %v2140_v11 = vmul.f32 %v2132_v1, %v2132_v1 }
 0xf60   :  { %2900 = vmatpush3.bf16.msra.mxu1 %v3025_v7 }
 0xf61   :  { %2141 = vadd.xlane.f32.xlu0 %v2139_v2  ;;  %2901 = vmatprep.subr.bf16.mxu1 %v3099_v9 }
 0xf63   :  { %2143 = vadd.xlane.f32.xlu1 %v2140_v11 }
 0xf64   :  { %2902 = vmatpush3.bf16.msra.mxu1 %v3026_v15 }
 0xf65   :  { %2903 = vmatprep.subr.bf16.mxu1 %v3099_v9 }
 0xf68   :  { %2904 = vmatpush3.bf16.msra.mxu1 %v3027_v16 }
 0xf69   :  { %2905 = vmatprep.subr.bf16.mxu1 %v3099_v9 }
 0xf6c   :  { %2906 = vmatpush3.bf16.msra.mxu1 %v3028_v19 }
 0xf6d   :  { %2907 = vmatprep.subr.bf16.mxu1 %v3099_v9 }
 0xf70   :  { %2908 = vmatpush3.bf16.msra.mxu1 %v3029_v20 }
 0xf71   :  { %2909 = vmatprep.subr.bf16.mxu1 %v3099_v9  ;;  %v2441_v9 = vld [vmem:[%s3762_s2 + $0x57] ss:$0 sm:$0xff] }
 0xf74   :  { %2910 = vmatpush3.bf16.msra.mxu1 %v3030_v22 }
 0xfea   :  { %v2134_v63 = vpop.xlane.xlu0 %2133 }
 0xfeb   :  { %v2137_v23 = vmul.f32 0.03125, %v2134_v63 }
 0xfec   :  { %v2136_v24 = vpop.xlane.xlu1 %2135 }
 0xfed   :  { %v2138_v26 = vmul.f32 0.03125, %v2136_v24  ;;  %v2147_v0 = vmul.f32 %v2137_v23, %v2137_v23  ;;  %v2155_v34 = vsub.f32 %v2131_v6, %v2137_v23 }
 0xfee   :  { %v2142_v12 = vpop.xlane.xlu0 %2141 }
 0xfef   :  { %v2145_v14 = vmul.f32 0.03125, %v2142_v12  ;;  %v2148_v29 = vmul.f32 %v2138_v26, %v2138_v26  ;;  %v2156_v61 = vsub.f32 %v2132_v1, %v2138_v26 }
 0xff0   :  { %v2144_v18 = vpop.xlane.xlu1 %2143 }
 0xff1   :  { %v2149_v30 = vsub.f32 %v2145_v14, %v2147_v0  ;;  %v2146_v31 = vmul.f32 0.03125, %v2144_v18 }
 0xff3   :  { %v2151_v57 = vadd.f32 1e-05, %v2149_v30  ;;  %v2150_v32 = vsub.f32 %v2146_v31, %v2148_v29 }
 0xff5   :  { %3087 = vrsqrt.f32 %v2151_v57  ;;  %v2152_v33 = vadd.f32 1e-05, %v2150_v32 }
 0xff7   :  { %3089 = vrsqrt.f32 %v2152_v33 }
 0xfff   :  { %v3088_v35 = vpop.eup %3087 }
0x1000   :  { %v2157_v36 = vmul.f32 %v3088_v35, %v2155_v34 }
0x1001   :  { %v3090_v37 = vpop.eup %3089 }
0x1002   :  { %v2158_v38 = vmul.f32 %v3090_v37, %v2156_v61  ;;  %v2164_v39 = vmul.f32 %v2441_v9, %v2157_v36 }
0x1004   :  { %v2165_v41 = vmul.f32 %v2441_v9, %v2158_v38  ;;  %v2171_v42 = vadd.f32 %v2442_v40, %v2164_v39 }
0x1006   :  { %v2172_v43 = vadd.f32 %v2442_v40, %v2165_v41 }
0x1008   :  { %v2173_v44 = vpack.c.bf16 %v2172_v43, %v2171_v42 }
0x100a   :  { %2912 = vmatmul.mubr.bf16.vlgmr.msra.gmra.mrb[32].mxu1 %v2173_v44 }
0x10dd   :  { %v2277_v46 = vpop.f32.mrb[32].mxu1 }
0x10de   :  { %v2278_v47 = vadd.f32 %v2443_v45, %v2277_v46  ;;  %v2913_v48 = vpop.f32.mrb[33].mxu1 }
0x10df   :  { %v2280_v49 = vpop.f32.mrb[34].mxu1 }
0x10e0   :  { %v2452_v17 = vmul.f32 -1.442695, %v2278_v47  ;;  %v2281_v50 = vadd.f32 %v2443_v45, %v2280_v49  ;;  %v2914_v51 = vpop.f32.mrb[35].mxu1 }
0x10e2   :  { %3091 = vpow2.f32 %v2452_v17  ;;  %v2453_v52 = vmul.f32 -1.442695, %v2281_v50 }
0x10e4   :  { %3093 = vpow2.f32 %v2453_v52 }
0x10ec   :  { %v3092_v53 = vpop.eup %3091 }
0x10ed   :  { %v2295_v55 = vadd.f32 1.0, %v3092_v53 }
0x10ee   :  { %v3094_v56 = vpop.eup %3093 }
0x10ef   :  { %3095 = vrcp.f32 %v2295_v55  ;;  %v2296_v58 = vadd.f32 1.0, %v3094_v56 }
0x10f1   :  { %3097 = vrcp.f32 %v2296_v58 }
0x10f9   :  { %v3096_v60 = vpop.eup %3095 }
0x10fa   :  { %v2301_v62 = vsel %vm2288_vm4, %v3096_v60, %v2278_v47 }
0x10fb   :  { %v3098_v21 = vpop.eup %3097  ;;  %2303 = vst [vmem:[%s3763_s3] sm:$0xff] %v2301_v62 }
0x10fc   :  { %v2302_v25 = vsel %vm2288_vm4, %v3098_v21, %v2281_v50 }
0x10fd   :  { %2304 = vst [vmem:[%s3763_s3 + $0x8] sm:$0xff] %v2302_v25 }

</bundles_post_ra>
